<compile_context>
chip_gen: v6e
topology: v6e:2x2x1
jax: 0.10.0
libtpu: 0.0.40
codegen_flags: <defaults>
</compile_context>

<pallas_src>
import functools

import jax
import jax.numpy as jnp
from jax.experimental import pallas as pl
from jax.experimental.pallas import tpu as pltpu

_SUBLANE = 8
_MiB = 1024 * 1024


def _round_up(x, m):
    return (x + m - 1) // m * m


# ---------------------------------------------------------------------------
# Hardware queries (all guarded; safe defaults if a query is unavailable).
# ---------------------------------------------------------------------------
def _device_kind():
    try:
        return jax.devices()[0].device_kind.lower()
    except Exception:
        return ""


def _is_megacore(kind):
    # Chips with 2 TensorCores per chip (grid can be sharded across cores).
    return ("v4" in kind) or ("v5p" in kind) or ("v7" in kind) or ("tpu7" in kind)


def _vmem_capacity_bytes(kind):
    try:
        return int(pltpu.get_tpu_info().vmem_capacity_bytes)
    except Exception:
        # v7x has 64 MiB / TensorCore; v5e/v6e have 128 MiB.  Unknown -> be
        # conservative.
        if ("v7" in kind) or ("tpu7" in kind) or (not kind):
            return 64 * _MiB
        return 128 * _MiB


# ---------------------------------------------------------------------------
# Kernel: fused chain of Linear (+ tanh) layers, all weights resident in VMEM.
# ---------------------------------------------------------------------------
def _make_mlp_kernel(num_layers, compute_dtype, tanh_last):
    """Ref order: (x_ref, w0, b0, ..., w{L-1}, b{L-1}, out_ref).

    Matmul operands are in `compute_dtype` (f32 or bf16); accumulation,
    bias-add and tanh always run in f32.
    """

    def kernel(*refs):
        x_ref = refs[0]
        out_ref = refs[-1]
        p = refs[1:-1]

        h = x_ref[...].astype(compute_dtype)
        for i in range(num_layers):
            w = p[2 * i][...]
            b = p[2 * i + 1][...]                       # (1, d_out) float32
            acc = jnp.dot(h, w, preferred_element_type=jnp.float32) + b
            if (i < num_layers - 1) or tanh_last:
                acc = jnp.tanh(acc)
            h = acc.astype(compute_dtype) if i < num_layers - 1 else acc
        out_ref[...] = h.astype(out_ref.dtype)

    return kernel


def _const_index_map(i):
    return (0, 0)


def _param_spec(shape, single_buffer):
    """BlockSpec for a grid-invariant (weight/bias) operand."""
    if single_buffer:
        try:
            # Constant index map -> no need for double-buffering; halves the
            # resident weight footprint in VMEM.
            return pl.BlockSpec(shape, _const_index_map,
                                pipeline_mode=pl.Buffered(1))
        except Exception:
            pass
    return pl.BlockSpec(shape, _const_index_map)


def _choose_batch_tiling(batch, per_row_bytes, fixed_bytes, budget, megacore):
    """Tile-count-first batch tiling: bounds padding to <8 rows per tile and
    respects the VMEM budget."""
    b8 = _round_up(max(batch, 1), _SUBLANE)
    avail = max(budget - fixed_bytes, _SUBLANE * per_row_bytes)
    tb_vmem = max((avail // max(per_row_bytes, 1)) // _SUBLANE * _SUBLANE, _SUBLANE)
    # Keep tiles <= 1024 rows once the batch is large so a few grid steps remain
    # for DMA/compute overlap; small batches run as a single tile (no pipeline
    # overhead) on single-TC chips.
    tb_cap = min(tb_vmem, 1024)
    if megacore:
        n = max(2, pl.cdiv(b8, tb_cap))
        if n % 2:
            n += 1
    else:
        n = 1 if b8 <= tb_cap else pl.cdiv(b8, tb_cap)
    tb = min(_round_up(pl.cdiv(b8, n), _SUBLANE), tb_vmem)
    grid = pl.cdiv(b8, tb)
    if megacore and grid > 1 and grid % 2:
        grid += 1                     # even grid so neither TensorCore idles
    return tb, grid


def _mlp_pallas_call(x, layers, *, tanh_last, compute_dtype,
                     single_buffer_weights, use_core_parallel,
                     vmem_budget, megacore):
    """Runs a chain of Linear(+tanh) layers as one fused pallas_call."""
    B, d_in = x.shape
    num_layers = len(layers)
    d_out = layers[-1][0].shape[1]
    out_dtype = x.dtype
    cd = jnp.dtype(compute_dtype)

    # No feature padding: weights keep true shapes; (no-op cast if caller
    # already ran prepare_params).
    cast_layers = [(w.astype(cd), b.astype(jnp.float32).reshape(1, -1))
                   for (w, b) in layers]

    # ---- VMEM footprint model (true dims) ----
    weight_bufs = 1 if single_buffer_weights else 2
    fixed_bytes = weight_bufs * sum(
        w.size * cd.itemsize + b.size * 4 for (w, b) in cast_layers)
    max_width = max([d_in] + [w.shape[1] for (w, _) in cast_layers])
    per_row_bytes = (2 * d_in * x.dtype.itemsize                    # x tile (dbl buf)
                     + 2 * d_out * jnp.dtype(out_dtype).itemsize    # out tile
                     + 6 * max_width * 4)                           # live f32 activations
    tb, grid = _choose_batch_tiling(B, per_row_bytes, fixed_bytes,
                                    vmem_budget, megacore)
    b_pad = tb * grid
    x_p = x if b_pad == B else jnp.pad(x, ((0, b_pad - B), (0, 0)))

    # ---- block specs: batch tiled, weights/biases fully resident ----
    in_specs = [pl.BlockSpec((tb, d_in), lambda i: (i, 0))]
    flat_params = []
    for (w, b) in cast_layers:
        flat_params += [w, b]
        in_specs.append(_param_spec(w.shape, single_buffer_weights))
        in_specs.append(_param_spec(b.shape, single_buffer_weights))
    out_spec = pl.BlockSpec((tb, d_out), lambda i: (i, 0))

    # ---- advisory cost estimate from true (unpadded) dims ----
    flops = 2 * B * sum(w.shape[0] * w.shape[1] for (w, _) in cast_layers)
    tanh_cols = sum(w.shape[1] for (w, _) in cast_layers[:-1])
    if tanh_last:
        tanh_cols += cast_layers[-1][0].shape[1]
    transcendentals = B * tanh_cols
    bytes_accessed = (x.size * x.dtype.itemsize
                      + sum(w.size * w.dtype.itemsize + b.size * b.dtype.itemsize
                            for (w, b) in cast_layers)
                      + B * d_out * jnp.dtype(out_dtype).itemsize)

    footprint = fixed_bytes + tb * per_row_bytes
    vmem_limit = int(min(vmem_budget, max(int(1.5 * footprint), 32 * _MiB)))

    dim_sem = ("parallel",)
    if megacore and use_core_parallel and grid >= 2 and grid % 2 == 0:
        core_parallel = getattr(pltpu, "CORE_PARALLEL", None)
        if core_parallel is not None:
            dim_sem = (core_parallel,)

    out_p = pl.pallas_call(
        _make_mlp_kernel(num_layers, compute_dtype, tanh_last),
        out_shape=jax.ShapeDtypeStruct((b_pad, d_out), out_dtype),
        grid_spec=pltpu.PrefetchScalarGridSpec(
            num_scalar_prefetch=0,
            grid=(grid,),
            in_specs=in_specs,
            out_specs=out_spec,
        ),
        compiler_params=pltpu.CompilerParams(
            dimension_semantics=dim_sem,
            vmem_limit_bytes=vmem_limit,
        ),
        cost_estimate=pl.CostEstimate(
            flops=flops,
            transcendentals=transcendentals,
            bytes_accessed=bytes_accessed,
        ),
    )(x_p, *flat_params)

    return out_p if b_pad == B else out_p[:B]


# ---------------------------------------------------------------------------
# Public API
# ---------------------------------------------------------------------------
def prepare_params(params, compute_dtype=jnp.float32):
    """One-time param preparation (hoisted out of the per-call hot path):
    weights cast to the matmul compute dtype, biases to f32 with shape (1, d)."""
    cd = jnp.dtype(compute_dtype)
    return [(jnp.asarray(w, cd), jnp.asarray(b, jnp.float32).reshape(1, -1))
            for (w, b) in params]


def dnn_forward(x, params, *, compute_dtype=jnp.float32, conservative=False):
    """Forward pass of DNN: (Linear + tanh) * (L-1), then Linear.

    x:      (B, d_in)
    params: list of (W, b); W: (d_in_i, d_out_i), b: (d_out_i,) or (1, d_out_i)
    compute_dtype: matmul operand dtype (f32 default; bf16 is the v6e/v7x MXU
        fast path).  Accumulation / bias / tanh always run in f32.
    conservative: disable single-buffered weight blocks and CORE_PARALLEL
        (safe fallback if the local toolchain rejects them).
    """
    kind = _device_kind()
    megacore = _is_megacore(kind)
    budget = (_vmem_capacity_bytes(kind) * 3) // 4   # leave compiler headroom
    single_buffer = not conservative
    use_core_parallel = not conservative

    cd = jnp.dtype(compute_dtype)
    weight_bufs = 1 if single_buffer else 2
    fixed_bytes = weight_bufs * sum(
        w.size * cd.itemsize + b.size * 4 for (w, b) in params)
    widths = [x.shape[1]] + [w.shape[1] for (w, _) in params]
    per_row_bytes = (2 * x.shape[1] * x.dtype.itemsize
                     + 2 * widths[-1] * x.dtype.itemsize
                     + 6 * max(widths) * 4)
    all_resident_fits = fixed_bytes + _SUBLANE * per_row_bytes <= budget

    call = functools.partial(
        _mlp_pallas_call,
        compute_dtype=compute_dtype,
        single_buffer_weights=single_buffer,
        use_core_parallel=use_core_parallel,
        vmem_budget=budget,
        megacore=megacore)

    if all_resident_fits:
        return call(x, params, tanh_last=False)

    # Scaling guard: the whole network's weights do not fit in VMEM -> stream
    # the network one layer per pallas_call (only that layer's weight resident).
    # TODO(synk): also tile the contraction / output-feature dims for single
    # layers whose weight alone exceeds the VMEM budget.
    h = x
    last = len(params) - 1
    for i, layer in enumerate(params):
        h = call(h, [layer], tanh_last=(i < last))
    return h


def init_dnn_params(key, layer_param):
    """Mimics torch.nn.Linear default init U(-k, k), k = 1/sqrt(fan_in).
    Returns list of (W, b) with W in (in_dim, out_dim) layout."""
    params = []
    for i in range(len(layer_param) - 1):
        fan_in, fan_out = layer_param[i], layer_param[i + 1]
        k = 1.0 / jnp.sqrt(jnp.float32(fan_in))
        key, kw, kb = jax.random.split(key, 3)
        w = jax.random.uniform(kw, (fan_in, fan_out), jnp.float32, -k, k)
        b = jax.random.uniform(kb, (1, fan_out), jnp.float32, -k, k)
        params.append((w, b))
    return params


def dnn_reference(x, params):
    """Pure-JAX reference of DNN.forward for correctness checking."""
    h = x
    for i, (w, b) in enumerate(params):
        h = h @ w + b
        if i < len(params) - 1:
            h = jnp.tanh(h)
    return h


if __name__ == "__main__":
    # MLP consistent with DNN(layer_param): 4 Linear layers, tanh in between.
    layer_param = [8, 64, 64, 64, 8]
    batch = 256

    key = jax.random.PRNGKey(0)
    key, kx = jax.random.split(key)
    x = jax.random.normal(kx, (batch, layer_param[0]), jnp.float32)
    params = init_dnn_params(key, layer_param)
    ref = dnn_reference(x, params)

    def run(x_in, p_in, **kw):
        fn = jax.jit(functools.partial(dnn_forward, **kw))
        try:
            return jax.block_until_ready(fn(x_in, p_in))
        except Exception:
            # Safe fallback: no single-buffered weight specs / CORE_PARALLEL.
            fn = jax.jit(functools.partial(dnn_forward, conservative=True, **kw))
            return jax.block_until_ready(fn(x_in, p_in))

    # f32 path (default on every generation; the only path used on v5e).
    params_f32 = prepare_params(params, jnp.float32)
    out_f32 = run(x, params_f32, compute_dtype=jnp.float32)
    assert out_f32.shape == (batch, layer_param[-1]), out_f32.shape
    assert jnp.allclose(out_f32, ref, atol=1e-4, rtol=1e-4), (
        float(jnp.max(jnp.abs(out_f32 - ref))))

    # bf16 matmul operands: only on generations with a bf16 VPU/EUP (v6e/v7x).
    kind = _device_kind()
    if ("v6" in kind) or ("v7" in kind) or ("tpu7" in kind):
        params_bf16 = prepare_params(params, jnp.bfloat16)
        out_bf16 = run(x, params_bf16, compute_dtype=jnp.bfloat16)
        assert out_bf16.shape == (batch, layer_param[-1]), out_bf16.shape
        assert jnp.allclose(out_bf16, ref, atol=5e-2, rtol=5e-2), (
            float(jnp.max(jnp.abs(out_bf16 - ref))))

    print("KERNEL_OK")
</pallas_src>

<mosaic_0001>
module attributes {stable_mosaic.version = 11 : i64} {
  func.func @kernel(%arg0: i32, %arg1: memref<256x8xf32, #tpu.memory_space<vmem>>, %arg2: memref<8x64xf32, #tpu.memory_space<vmem>>, %arg3: memref<1x64xf32, #tpu.memory_space<vmem>>, %arg4: memref<64x64xf32, #tpu.memory_space<vmem>>, %arg5: memref<1x64xf32, #tpu.memory_space<vmem>>, %arg6: memref<64x64xf32, #tpu.memory_space<vmem>>, %arg7: memref<1x64xf32, #tpu.memory_space<vmem>>, %arg8: memref<64x8xf32, #tpu.memory_space<vmem>>, %arg9: memref<1x8xf32, #tpu.memory_space<vmem>>, %arg10: memref<256x8xf32, #tpu.memory_space<vmem>>) attributes {dimension_semantics = [#tpu.dimension_semantics<parallel>], iteration_bounds = array<i64: 1>, scalar_prefetch = 0 : i64, scratch_operands = 0 : i64, tpu.core_type = #tpu.core_type<tc>, window_params = [{transform_indices = @transform_0, window_bounds = array<i64: 256, 8>}, {pipeline_mode = #tpu.pipeline_mode<synchronous>, transform_indices = @transform_1, window_bounds = array<i64: 8, 64>}, {pipeline_mode = #tpu.pipeline_mode<synchronous>, transform_indices = @transform_2, window_bounds = array<i64: 1, 64>}, {pipeline_mode = #tpu.pipeline_mode<synchronous>, transform_indices = @transform_3, window_bounds = array<i64: 64, 64>}, {pipeline_mode = #tpu.pipeline_mode<synchronous>, transform_indices = @transform_4, window_bounds = array<i64: 1, 64>}, {pipeline_mode = #tpu.pipeline_mode<synchronous>, transform_indices = @transform_5, window_bounds = array<i64: 64, 64>}, {pipeline_mode = #tpu.pipeline_mode<synchronous>, transform_indices = @transform_6, window_bounds = array<i64: 1, 64>}, {pipeline_mode = #tpu.pipeline_mode<synchronous>, transform_indices = @transform_7, window_bounds = array<i64: 64, 8>}, {pipeline_mode = #tpu.pipeline_mode<synchronous>, transform_indices = @transform_8, window_bounds = array<i64: 1, 8>}, {transform_indices = @transform_9, window_bounds = array<i64: 256, 8>}]} {
    %c0 = arith.constant 0 : index
    %c0_0 = arith.constant 0 : index
    %0 = vector.load %arg1[%c0, %c0_0] : memref<256x8xf32, #tpu.memory_space<vmem>>, vector<256x8xf32>
    %c0_1 = arith.constant 0 : index
    %c0_2 = arith.constant 0 : index
    %1 = vector.load %arg2[%c0_1, %c0_2] : memref<8x64xf32, #tpu.memory_space<vmem>>, vector<8x64xf32>
    %c0_3 = arith.constant 0 : index
    %c0_4 = arith.constant 0 : index
    %2 = vector.load %arg3[%c0_3, %c0_4] : memref<1x64xf32, #tpu.memory_space<vmem>>, vector<1x64xf32>
    %cst = arith.constant dense<0.000000e+00> : vector<256x64xf32>
    %3 = tpu.matmul %0, %1, %cst {dimension_numbers = #tpu.dot_dimension_numbers<[1], [0], [0], [1], [0, 0, 1, 1], [], []>} : vector<256x8xf32>, vector<8x64xf32>, vector<256x64xf32> -> vector<256x64xf32>
    %4 = vector.broadcast %2 : vector<1x64xf32> to vector<256x64xf32>
    %5 = arith.addf %3, %4 : vector<256x64xf32>
    %6 = math.tanh %5 : vector<256x64xf32>
    %c0_5 = arith.constant 0 : index
    %c0_6 = arith.constant 0 : index
    %7 = vector.load %arg4[%c0_5, %c0_6] : memref<64x64xf32, #tpu.memory_space<vmem>>, vector<64x64xf32>
    %c0_7 = arith.constant 0 : index
    %c0_8 = arith.constant 0 : index
    %8 = vector.load %arg5[%c0_7, %c0_8] : memref<1x64xf32, #tpu.memory_space<vmem>>, vector<1x64xf32>
    %cst_9 = arith.constant dense<0.000000e+00> : vector<256x64xf32>
    %9 = tpu.matmul %6, %7, %cst_9 {dimension_numbers = #tpu.dot_dimension_numbers<[1], [0], [0], [1], [0, 0, 1, 1], [], []>} : vector<256x64xf32>, vector<64x64xf32>, vector<256x64xf32> -> vector<256x64xf32>
    %10 = vector.broadcast %8 : vector<1x64xf32> to vector<256x64xf32>
    %11 = arith.addf %9, %10 : vector<256x64xf32>
    %12 = math.tanh %11 : vector<256x64xf32>
    %c0_10 = arith.constant 0 : index
    %c0_11 = arith.constant 0 : index
    %13 = vector.load %arg6[%c0_10, %c0_11] : memref<64x64xf32, #tpu.memory_space<vmem>>, vector<64x64xf32>
    %c0_12 = arith.constant 0 : index
    %c0_13 = arith.constant 0 : index
    %14 = vector.load %arg7[%c0_12, %c0_13] : memref<1x64xf32, #tpu.memory_space<vmem>>, vector<1x64xf32>
    %cst_14 = arith.constant dense<0.000000e+00> : vector<256x64xf32>
    %15 = tpu.matmul %12, %13, %cst_14 {dimension_numbers = #tpu.dot_dimension_numbers<[1], [0], [0], [1], [0, 0, 1, 1], [], []>} : vector<256x64xf32>, vector<64x64xf32>, vector<256x64xf32> -> vector<256x64xf32>
    %16 = vector.broadcast %14 : vector<1x64xf32> to vector<256x64xf32>
    %17 = arith.addf %15, %16 : vector<256x64xf32>
    %18 = math.tanh %17 : vector<256x64xf32>
    %c0_15 = arith.constant 0 : index
    %c0_16 = arith.constant 0 : index
    %19 = vector.load %arg8[%c0_15, %c0_16] : memref<64x8xf32, #tpu.memory_space<vmem>>, vector<64x8xf32>
    %c0_17 = arith.constant 0 : index
    %c0_18 = arith.constant 0 : index
    %20 = vector.load %arg9[%c0_17, %c0_18] : memref<1x8xf32, #tpu.memory_space<vmem>>, vector<1x8xf32>
    %cst_19 = arith.constant dense<0.000000e+00> : vector<256x8xf32>
    %21 = tpu.matmul %18, %19, %cst_19 {dimension_numbers = #tpu.dot_dimension_numbers<[1], [0], [0], [1], [0, 0, 1, 1], [], []>} : vector<256x64xf32>, vector<64x8xf32>, vector<256x8xf32> -> vector<256x8xf32>
    %22 = vector.broadcast %20 : vector<1x8xf32> to vector<256x8xf32>
    %23 = arith.addf %21, %22 : vector<256x8xf32>
    %c0_20 = arith.constant 0 : index
    %c0_21 = arith.constant 0 : index
    %24 = vector.load %arg10[%c0_20, %c0_21] : memref<256x8xf32, #tpu.memory_space<vmem>>, vector<256x8xf32>
    tpu.vector_store %arg10[%c0_20, %c0_21], %23 {strides = array<i32>} : memref<256x8xf32, #tpu.memory_space<vmem>>, vector<256x8xf32>,
    return
  }
  func.func @transform_0(%arg0: i32) -> (i32, i32) {
    %c0_i32 = arith.constant 0 : i32
    %c0_i32_0 = arith.constant 0 : i32
    return %arg0, %c0_i32 : i32, i32
  }
  func.func @transform_1(%arg0: i32) -> (i32, i32) {
    %c0_i32 = arith.constant 0 : i32
    %c0_i32_0 = arith.constant 0 : i32
    %c0_i32_1 = arith.constant 0 : i32
    return %c0_i32, %c0_i32_0 : i32, i32
  }
  func.func @transform_2(%arg0: i32) -> (i32, i32) {
    %c0_i32 = arith.constant 0 : i32
    %c0_i32_0 = arith.constant 0 : i32
    %c0_i32_1 = arith.constant 0 : i32
    return %c0_i32, %c0_i32_0 : i32, i32
  }
  func.func @transform_3(%arg0: i32) -> (i32, i32) {
    %c0_i32 = arith.constant 0 : i32
    %c0_i32_0 = arith.constant 0 : i32
    %c0_i32_1 = arith.constant 0 : i32
    return %c0_i32, %c0_i32_0 : i32, i32
  }
  func.func @transform_4(%arg0: i32) -> (i32, i32) {
    %c0_i32 = arith.constant 0 : i32
    %c0_i32_0 = arith.constant 0 : i32
    %c0_i32_1 = arith.constant 0 : i32
    return %c0_i32, %c0_i32_0 : i32, i32
  }
  func.func @transform_5(%arg0: i32) -> (i32, i32) {
    %c0_i32 = arith.constant 0 : i32
    %c0_i32_0 = arith.constant 0 : i32
    %c0_i32_1 = arith.constant 0 : i32
    return %c0_i32, %c0_i32_0 : i32, i32
  }
  func.func @transform_6(%arg0: i32) -> (i32, i32) {
    %c0_i32 = arith.constant 0 : i32
    %c0_i32_0 = arith.constant 0 : i32
    %c0_i32_1 = arith.constant 0 : i32
    return %c0_i32, %c0_i32_0 : i32, i32
  }
  func.func @transform_7(%arg0: i32) -> (i32, i32) {
    %c0_i32 = arith.constant 0 : i32
    %c0_i32_0 = arith.constant 0 : i32
    %c0_i32_1 = arith.constant 0 : i32
    return %c0_i32, %c0_i32_0 : i32, i32
  }
  func.func @transform_8(%arg0: i32) -> (i32, i32) {
    %c0_i32 = arith.constant 0 : i32
    %c0_i32_0 = arith.constant 0 : i32
    %c0_i32_1 = arith.constant 0 : i32
    return %c0_i32, %c0_i32_0 : i32, i32
  }
  func.func @transform_9(%arg0: i32) -> (i32, i32) {
    %c0_i32 = arith.constant 0 : i32
    %c0_i32_0 = arith.constant 0 : i32
    return %arg0, %c0_i32 : i32, i32
  }
}

module attributes {stable_mosaic.version = 11 : i64} {
  func.func @kernel(%arg0: i32, %arg1: memref<256x8xf32, #tpu.memory_space<vmem>>, %arg2: memref<8x64xf32, #tpu.memory_space<vmem>>, %arg3: memref<1x64xf32, #tpu.memory_space<vmem>>, %arg4: memref<64x64xf32, #tpu.memory_space<vmem>>, %arg5: memref<1x64xf32, #tpu.memory_space<vmem>>, %arg6: memref<64x64xf32, #tpu.memory_space<vmem>>, %arg7: memref<1x64xf32, #tpu.memory_space<vmem>>, %arg8: memref<64x8xf32, #tpu.memory_space<vmem>>, %arg9: memref<1x8xf32, #tpu.memory_space<vmem>>, %arg10: memref<256x8xf32, #tpu.memory_space<vmem>>) attributes {dimension_semantics = [#tpu.dimension_semantics<parallel>], iteration_bounds = array<i64: 1>, scalar_prefetch = 0 : i64, scratch_operands = 0 : i64, tpu.core_type = #tpu.core_type<tc>, window_params = [{transform_indices = @transform_0, window_bounds = array<i64: 256, 8>}, {pipeline_mode = #tpu.pipeline_mode<synchronous>, transform_indices = @transform_1, window_bounds = array<i64: 8, 64>}, {pipeline_mode = #tpu.pipeline_mode<synchronous>, transform_indices = @transform_2, window_bounds = array<i64: 1, 64>}, {pipeline_mode = #tpu.pipeline_mode<synchronous>, transform_indices = @transform_3, window_bounds = array<i64: 64, 64>}, {pipeline_mode = #tpu.pipeline_mode<synchronous>, transform_indices = @transform_4, window_bounds = array<i64: 1, 64>}, {pipeline_mode = #tpu.pipeline_mode<synchronous>, transform_indices = @transform_5, window_bounds = array<i64: 64, 64>}, {pipeline_mode = #tpu.pipeline_mode<synchronous>, transform_indices = @transform_6, window_bounds = array<i64: 1, 64>}, {pipeline_mode = #tpu.pipeline_mode<synchronous>, transform_indices = @transform_7, window_bounds = array<i64: 64, 8>}, {pipeline_mode = #tpu.pipeline_mode<synchronous>, transform_indices = @transform_8, window_bounds = array<i64: 1, 8>}, {transform_indices = @transform_9, window_bounds = array<i64: 256, 8>}]} {
    %c0 = arith.constant 0 : index
    %c0_0 = arith.constant 0 : index
    %0 = vector.load %arg1[%c0, %c0_0] : memref<256x8xf32, #tpu.memory_space<vmem>>, vector<256x8xf32>
    %c0_1 = arith.constant 0 : index
    %c0_2 = arith.constant 0 : index
    %1 = vector.load %arg2[%c0_1, %c0_2] : memref<8x64xf32, #tpu.memory_space<vmem>>, vector<8x64xf32>
    %c0_3 = arith.constant 0 : index
    %c0_4 = arith.constant 0 : index
    %2 = vector.load %arg3[%c0_3, %c0_4] : memref<1x64xf32, #tpu.memory_space<vmem>>, vector<1x64xf32>
    %cst = arith.constant dense<0.000000e+00> : vector<256x64xf32>
    %3 = tpu.matmul %0, %1, %cst {dimension_numbers = #tpu.dot_dimension_numbers<[1], [0], [0], [1], [0, 0, 1, 1], [], []>} : vector<256x8xf32>, vector<8x64xf32>, vector<256x64xf32> -> vector<256x64xf32>
    %4 = vector.broadcast %2 : vector<1x64xf32> to vector<256x64xf32>
    %5 = arith.addf %3, %4 : vector<256x64xf32>
    %6 = math.tanh %5 : vector<256x64xf32>
    %c0_5 = arith.constant 0 : index
    %c0_6 = arith.constant 0 : index
    %7 = vector.load %arg4[%c0_5, %c0_6] : memref<64x64xf32, #tpu.memory_space<vmem>>, vector<64x64xf32>
    %c0_7 = arith.constant 0 : index
    %c0_8 = arith.constant 0 : index
    %8 = vector.load %arg5[%c0_7, %c0_8] : memref<1x64xf32, #tpu.memory_space<vmem>>, vector<1x64xf32>
    %cst_9 = arith.constant dense<0.000000e+00> : vector<256x64xf32>
    %9 = tpu.matmul %6, %7, %cst_9 {dimension_numbers = #tpu.dot_dimension_numbers<[1], [0], [0], [1], [0, 0, 1, 1], [], []>} : vector<256x64xf32>, vector<64x64xf32>, vector<256x64xf32> -> vector<256x64xf32>
    %10 = vector.broadcast %8 : vector<1x64xf32> to vector<256x64xf32>
    %11 = arith.addf %9, %10 : vector<256x64xf32>
    %12 = math.tanh %11 : vector<256x64xf32>
    %c0_10 = arith.constant 0 : index
    %c0_11 = arith.constant 0 : index
    %13 = vector.load %arg6[%c0_10, %c0_11] : memref<64x64xf32, #tpu.memory_space<vmem>>, vector<64x64xf32>
    %c0_12 = arith.constant 0 : index
    %c0_13 = arith.constant 0 : index
    %14 = vector.load %arg7[%c0_12, %c0_13] : memref<1x64xf32, #tpu.memory_space<vmem>>, vector<1x64xf32>
    %cst_14 = arith.constant dense<0.000000e+00> : vector<256x64xf32>
    %15 = tpu.matmul %12, %13, %cst_14 {dimension_numbers = #tpu.dot_dimension_numbers<[1], [0], [0], [1], [0, 0, 1, 1], [], []>} : vector<256x64xf32>, vector<64x64xf32>, vector<256x64xf32> -> vector<256x64xf32>
    %16 = vector.broadcast %14 : vector<1x64xf32> to vector<256x64xf32>
    %17 = arith.addf %15, %16 : vector<256x64xf32>
    %18 = math.tanh %17 : vector<256x64xf32>
    %c0_15 = arith.constant 0 : index
    %c0_16 = arith.constant 0 : index
    %19 = vector.load %arg8[%c0_15, %c0_16] : memref<64x8xf32, #tpu.memory_space<vmem>>, vector<64x8xf32>
    %c0_17 = arith.constant 0 : index
    %c0_18 = arith.constant 0 : index
    %20 = vector.load %arg9[%c0_17, %c0_18] : memref<1x8xf32, #tpu.memory_space<vmem>>, vector<1x8xf32>
    %cst_19 = arith.constant dense<0.000000e+00> : vector<256x8xf32>
    %21 = tpu.matmul %18, %19, %cst_19 {dimension_numbers = #tpu.dot_dimension_numbers<[1], [0], [0], [1], [0, 0, 1, 1], [], []>} : vector<256x64xf32>, vector<64x8xf32>, vector<256x8xf32> -> vector<256x8xf32>
    %22 = vector.broadcast %20 : vector<1x8xf32> to vector<256x8xf32>
    %23 = arith.addf %21, %22 : vector<256x8xf32>
    %c0_20 = arith.constant 0 : index
    %c0_21 = arith.constant 0 : index
    %24 = vector.load %arg10[%c0_20, %c0_21] : memref<256x8xf32, #tpu.memory_space<vmem>>, vector<256x8xf32>
    tpu.vector_store %arg10[%c0_20, %c0_21], %23 {strides = array<i32>} : memref<256x8xf32, #tpu.memory_space<vmem>>, vector<256x8xf32>,
    return
  }
  func.func @transform_0(%arg0: i32) -> (i32, i32) {
    %c0_i32 = arith.constant 0 : i32
    %c0_i32_0 = arith.constant 0 : i32
    return %arg0, %c0_i32 : i32, i32
  }
  func.func @transform_1(%arg0: i32) -> (i32, i32) {
    %c0_i32 = arith.constant 0 : i32
    %c0_i32_0 = arith.constant 0 : i32
    %c0_i32_1 = arith.constant 0 : i32
    return %c0_i32, %c0_i32_0 : i32, i32
  }
  func.func @transform_2(%arg0: i32) -> (i32, i32) {
    %c0_i32 = arith.constant 0 : i32
    %c0_i32_0 = arith.constant 0 : i32
    %c0_i32_1 = arith.constant 0 : i32
    return %c0_i32, %c0_i32_0 : i32, i32
  }
  func.func @transform_3(%arg0: i32) -> (i32, i32) {
    %c0_i32 = arith.constant 0 : i32
    %c0_i32_0 = arith.constant 0 : i32
    %c0_i32_1 = arith.constant 0 : i32
    return %c0_i32, %c0_i32_0 : i32, i32
  }
  func.func @transform_4(%arg0: i32) -> (i32, i32) {
    %c0_i32 = arith.constant 0 : i32
    %c0_i32_0 = arith.constant 0 : i32
    %c0_i32_1 = arith.constant 0 : i32
    return %c0_i32, %c0_i32_0 : i32, i32
  }
  func.func @transform_5(%arg0: i32) -> (i32, i32) {
    %c0_i32 = arith.constant 0 : i32
    %c0_i32_0 = arith.constant 0 : i32
    %c0_i32_1 = arith.constant 0 : i32
    return %c0_i32, %c0_i32_0 : i32, i32
  }
  func.func @transform_6(%arg0: i32) -> (i32, i32) {
    %c0_i32 = arith.constant 0 : i32
    %c0_i32_0 = arith.constant 0 : i32
    %c0_i32_1 = arith.constant 0 : i32
    return %c0_i32, %c0_i32_0 : i32, i32
  }
  func.func @transform_7(%arg0: i32) -> (i32, i32) {
    %c0_i32 = arith.constant 0 : i32
    %c0_i32_0 = arith.constant 0 : i32
    %c0_i32_1 = arith.constant 0 : i32
    return %c0_i32, %c0_i32_0 : i32, i32
  }
  func.func @transform_8(%arg0: i32) -> (i32, i32) {
    %c0_i32 = arith.constant 0 : i32
    %c0_i32_0 = arith.constant 0 : i32
    %c0_i32_1 = arith.constant 0 : i32
    return %c0_i32, %c0_i32_0 : i32, i32
  }
  func.func @transform_9(%arg0: i32) -> (i32, i32) {
    %c0_i32 = arith.constant 0 : i32
    %c0_i32_0 = arith.constant 0 : i32
    return %arg0, %c0_i32 : i32, i32
  }
}

</mosaic_0001>

<bundles_post_ra>
// kernel: dnn_forward.1
= control target key start
LH: loop header
LB: loop body
LE: loop exit
PB: predicated region body
PF: predicated region fallthrough
CT: control target
= control target key end

     0   :  { %vm72_vm0 = vcmask 64512   ;;  %vm441_vm1 = vcmask 523264   ;;  %s2913_s1 = inlined_call_operand.vmem [shape: f32[8,64], index: 1, kind: input, shape index: {}]   ;;  %s2914_s0 = inlined_call_operand.vmem [shape: f32[256,8], index: 0, kind: input, shape index: {}]   ;;  %s2915_s3 = inlined_call_operand.vmem [shape: f32[64,64], index: 3, kind: input, shape index: {}]   ;;  %s2916_s5 = inlined_call_operand.vmem [shape: f32[64,64], index: 5, kind: input, shape index: {}]   ;;  %s2917_s2 = inlined_call_operand.vmem [shape: f32[1,64], index: 2, kind: input, shape index: {}]   ;;  %s2918_s7 = inlined_call_operand.vmem [shape: f32[64,8], index: 7, kind: input, shape index: {}]   ;;  %s2919_s4 = inlined_call_operand.vmem [shape: f32[1,64], index: 4, kind: input, shape index: {}]   ;;  %s2920_s6 = inlined_call_operand.vmem [shape: f32[1,64], index: 6, kind: input, shape index: {}]   ;;  %s2921_s8 = inlined_call_operand.vmem [shape: f32[1,8], index: 8, kind: input, shape index: {}]   ;;  %s2922_s9 = inlined_call_operand.vmem [shape: f32[256,8], index: 9, kind: output, shape index: {}]  }
   0x1   :  { %v64_v0 = vld [vmem:[%s2913_s1] sm:$0xff]  ;;  %v33_v2 = vld [vmem:[%s2914_s0 + $0x8] sm:$0xff]  ;;  %v34_v3 = vld [vmem:[%s2914_s0 + $0x10] sm:$0xff] }
   0x2   :  { %v32_v1 = vld [vmem:[%s2914_s0] sm:$0xff]  ;;  %1820 = vmatprep.subr.mxu0 %v64_v0  ;;  %v35_v4 = vld [vmem:[%s2914_s0 + $0x18] sm:$0xff]  ;;  %v37_v6 = vld [vmem:[%s2914_s0 + $0x28] sm:$0xff] }
   0x3   :  { %1822 = vmatprep.mubr.msk.f32.mxu0 %vm72_vm0, %v32_v1  ;;  %1821 = vmatpush3.msra.mxu0 %v64_v0  ;;  %v36_v5 = vld [vmem:[%s2914_s0 + $0x20] sm:$0xff]  ;;  %v38_v7 = vld [vmem:[%s2914_s0 + $0x30] sm:$0xff]  ;;  %v39_v8 = vld [vmem:[%s2914_s0 + $0x38] sm:$0xff] }
   0x4   :  { %1823 = vmatmul.mubr.msk.f32.vlgmr.msra.gmra.mxu0 %vm72_vm0, %v33_v2  ;;  %v40_v9 = vld [vmem:[%s2914_s0 + $0x40] sm:$0xff]  ;;  %v41_v10 = vld [vmem:[%s2914_s0 + $0x48] sm:$0xff]  ;;  %v42_v11 = vld [vmem:[%s2914_s0 + $0x50] sm:$0xff] }
   0x5   :  { %1825 = vmatprep.mubr.msk.f32.mxu0 %vm72_vm0, %v34_v3  ;;  %v43_v12 = vld [vmem:[%s2914_s0 + $0x58] sm:$0xff]  ;;  %v44_v13 = vld [vmem:[%s2914_s0 + $0x60] sm:$0xff]  ;;  %v45_v14 = vld [vmem:[%s2914_s0 + $0x68] sm:$0xff] }
   0x6   :  { %v46_v15 = vld [vmem:[%s2914_s0 + $0x70] sm:$0xff]  ;;  %v47_v16 = vld [vmem:[%s2914_s0 + $0x78] sm:$0xff]  ;;  %v48_v17 = vld [vmem:[%s2914_s0 + $0x80] sm:$0xff] }
   0x7   :  { %v49_v18 = vld [vmem:[%s2914_s0 + $0x88] sm:$0xff]  ;;  %v50_v19 = vld [vmem:[%s2914_s0 + $0x90] sm:$0xff]  ;;  %v51_v20 = vld [vmem:[%s2914_s0 + $0x98] sm:$0xff] }
   0x8   :  { %1826 = vmatmul.mubr.msk.f32.gmra.mxu0 %vm72_vm0, %v35_v4  ;;  %v52_v21 = vld [vmem:[%s2914_s0 + $0xa0] sm:$0xff]  ;;  %v53_v22 = vld [vmem:[%s2914_s0 + $0xa8] sm:$0xff]  ;;  %v54_v23 = vld [vmem:[%s2914_s0 + $0xb0] sm:$0xff] }
   0x9   :  { %1828 = vmatprep.mubr.msk.f32.mxu0 %vm72_vm0, %v36_v5  ;;  %v55_v24 = vld [vmem:[%s2914_s0 + $0xb8] sm:$0xff]  ;;  %v56_v25 = vld [vmem:[%s2914_s0 + $0xc0] sm:$0xff]  ;;  %v57_v26 = vld [vmem:[%s2914_s0 + $0xc8] sm:$0xff] }
   0xa   :  { %v58_v27 = vld [vmem:[%s2914_s0 + $0xd0] sm:$0xff]  ;;  %v59_v28 = vld [vmem:[%s2914_s0 + $0xd8] sm:$0xff]  ;;  %v60_v29 = vld [vmem:[%s2914_s0 + $0xe0] sm:$0xff] }
   0xb   :  { %v61_v30 = vld [vmem:[%s2914_s0 + $0xe8] sm:$0xff]  ;;  %v62_v31 = vld [vmem:[%s2914_s0 + $0xf0] sm:$0xff]  ;;  %v63_v32 = vld [vmem:[%s2914_s0 + $0xf8] sm:$0xff] }
   0xc   :  { %1829 = vmatmul.mubr.msk.f32.gmra.mxu0 %vm72_vm0, %v37_v6  ;;  %v433_v33 = vld [vmem:[%s2915_s3 + $0x38] sm:$0xff]  ;;  %v432_v34 = vld [vmem:[%s2915_s3 + $0x30] sm:$0xff]  ;;  %v431_v35 = vld [vmem:[%s2915_s3 + $0x28] sm:$0xff] }
   0xd   :  { %1831 = vmatprep.mubr.msk.f32.mxu0 %vm72_vm0, %v38_v7  ;;  %1870 = vmatprep.subr.mxu1 %v433_v33  ;;  %v430_v36 = vld [vmem:[%s2915_s3 + $0x20] sm:$0xff]  ;;  %v429_v37 = vld [vmem:[%s2915_s3 + $0x18] sm:$0xff]  ;;  %v428_v38 = vld [vmem:[%s2915_s3 + $0x10] sm:$0xff] }
   0xe   :  { %1871 = vmatpush3.msra.mxu1 %v433_v33  ;;  %v427_v39 = vld [vmem:[%s2915_s3 + $0x8] sm:$0xff]  ;;  %v426_v40 = vld [vmem:[%s2915_s3] sm:$0xff]  ;;  %v802_v41 = vld [vmem:[%s2916_s5 + $0x38] sm:$0xff] }
   0xf   :  { %1872 = vmatprep.subr.mxu1 %v432_v34  ;;  %v801_v42 = vld [vmem:[%s2916_s5 + $0x30] sm:$0xff]  ;;  %1934 = vmatprep.subr.mxu0 %v802_v41  ;;  %v800_v43 = vld [vmem:[%s2916_s5 + $0x28] sm:$0xff]  ;;  %v799_v44 = vld [vmem:[%s2916_s5 + $0x20] sm:$0xff] }
  0x10   :  { %1832 = vmatmul.mubr.msk.f32.gmra.mxu0 %vm72_vm0, %v39_v8  ;;  %1873 = vmatpush3.msra.mxu1 %v432_v34  ;;  %v798_v45 = vld [vmem:[%s2916_s5 + $0x18] sm:$0xff]  ;;  %v797_v46 = vld [vmem:[%s2916_s5 + $0x10] sm:$0xff]  ;;  %v2496_v47 = vld [vmem:[%s2917_s2] ss:$0 sm:$0xff] }
  0x11   :  { %1834 = vmatprep.mubr.msk.f32.mxu0 %vm72_vm0, %v40_v9  ;;  %1874 = vmatprep.subr.mxu1 %v431_v35 }
  0x12   :  { %1875 = vmatpush3.msra.mxu1 %v431_v35  ;;  %1935 = vmatpush3.msra.mxu0 %v802_v41 }
  0x13   :  { %1876 = vmatprep.subr.mxu1 %v430_v36  ;;  %1936 = vmatprep.subr.mxu0 %v801_v42 }
  0x14   :  { %1835 = vmatmul.mubr.msk.f32.gmra.mxu0 %vm72_vm0, %v41_v10  ;;  %1877 = vmatpush3.msra.mxu1 %v430_v36 }
  0x15   :  { %1837 = vmatprep.mubr.msk.f32.mxu0 %vm72_vm0, %v42_v11  ;;  %1878 = vmatprep.subr.mxu1 %v429_v37 }
  0x16   :  { %1879 = vmatpush3.msra.mxu1 %v429_v37  ;;  %1937 = vmatpush3.msra.mxu0 %v801_v42 }
  0x17   :  { %1880 = vmatprep.subr.mxu1 %v428_v38  ;;  %1938 = vmatprep.subr.mxu0 %v800_v43 }
  0x18   :  { %1838 = vmatmul.mubr.msk.f32.gmra.mxu0 %vm72_vm0, %v43_v12  ;;  %1881 = vmatpush3.msra.mxu1 %v428_v38 }
  0x19   :  { %1840 = vmatprep.mubr.msk.f32.mxu0 %vm72_vm0, %v44_v13  ;;  %1882 = vmatprep.subr.mxu1 %v427_v39 }
  0x1a   :  { %1883 = vmatpush3.msra.mxu1 %v427_v39  ;;  %1939 = vmatpush3.msra.mxu0 %v800_v43 }
  0x1b   :  { %1884 = vmatprep.subr.mxu1 %v426_v40  ;;  %1940 = vmatprep.subr.mxu0 %v799_v44 }
  0x1c   :  { %1841 = vmatmul.mubr.msk.f32.gmra.mxu0 %vm72_vm0, %v45_v14  ;;  %1885 = vmatpush3.msra.mxu1 %v426_v40 }
  0x1d   :  { %1843 = vmatprep.mubr.msk.f32.mxu0 %vm72_vm0, %v46_v15  ;;  %1941 = vmatpush3.msra.mxu0 %v799_v44 }
  0x1e   :  { %1942 = vmatprep.subr.mxu0 %v798_v45 }
  0x1f   :  { %1943 = vmatpush3.msra.mxu0 %v798_v45 }
  0x20   :  { %1844 = vmatmul.mubr.msk.f32.gmra.mxu0 %vm72_vm0, %v47_v16  ;;  %1944 = vmatprep.subr.mxu0 %v797_v46 }
  0x21   :  { %1846 = vmatprep.mubr.msk.f32.mxu0 %vm72_vm0, %v48_v17  ;;  %1945 = vmatpush3.msra.mxu0 %v797_v46 }
  0x24   :  { %1847 = vmatmul.mubr.msk.f32.gmra.mxu0 %vm72_vm0, %v49_v18 }
  0x25   :  { %1849 = vmatprep.mubr.msk.f32.mxu0 %vm72_vm0, %v50_v19 }
  0x28   :  { %1850 = vmatmul.mubr.msk.f32.gmra.mxu0 %vm72_vm0, %v51_v20 }
  0x29   :  { %1852 = vmatprep.mubr.msk.f32.mxu0 %vm72_vm0, %v52_v21 }
  0x2c   :  { %1853 = vmatmul.mubr.msk.f32.gmra.mxu0 %vm72_vm0, %v53_v22 }
  0x2d   :  { %1855 = vmatprep.mubr.msk.f32.mxu0 %vm72_vm0, %v54_v23 }
  0x30   :  { %1856 = vmatmul.mubr.msk.f32.gmra.mxu0 %vm72_vm0, %v55_v24 }
  0x31   :  { %1858 = vmatprep.mubr.msk.f32.mxu0 %vm72_vm0, %v56_v25 }
  0x34   :  { %1859 = vmatmul.mubr.msk.f32.gmra.mxu0 %vm72_vm0, %v57_v26 }
  0x35   :  { %1861 = vmatprep.mubr.msk.f32.mxu0 %vm72_vm0, %v58_v27 }
  0x38   :  { %1862 = vmatmul.mubr.msk.f32.gmra.mxu0 %vm72_vm0, %v59_v28 }
  0x39   :  { %1864 = vmatprep.mubr.msk.f32.mxu0 %vm72_vm0, %v60_v29 }
  0x3c   :  { %1865 = vmatmul.mubr.msk.f32.gmra.mxu0 %vm72_vm0, %v61_v30 }
  0x3d   :  { %1867 = vmatprep.mubr.msk.f32.mxu0 %vm72_vm0, %v62_v31 }
  0x40   :  { %1868 = vmatmul.mubr.msk.f32.gmra.mxu0 %vm72_vm0, %v63_v32 }
  0xc4   :  { %v1824_v48 = vpop.f32.mrf.mxu0 }
  0xc5   :  { %v241_v49 = vadd.f32 %v1824_v48, %v2496_v47 }
  0xc6   :  { %v235_v50 = vpop.f32.mrf.mxu0 }
  0xc7   :  { %v236_v51 = vadd.f32 %v2496_v47, %v235_v50 }
  0xc8   :  { %v1827_v52 = vpop.f32.mrf.mxu0 }
  0xc9   :  { %2078 = vtanh.f32 %v236_v51  ;;  %v251_v53 = vadd.f32 %v1827_v52, %v2496_v47 }
  0xca   :  { %2080 = vtanh.f32 %v241_v49  ;;  %v245_v54 = vpop.f32.mrf.mxu0 }
  0xcb   :  { %v246_v55 = vadd.f32 %v2496_v47, %v245_v54 }
  0xcc   :  { %v1830_v56 = vpop.f32.mrf.mxu0 }
  0xcd   :  { %2082 = vtanh.f32 %v246_v55  ;;  %v261_v57 = vadd.f32 %v1830_v56, %v2496_v47 }
  0xce   :  { %2084 = vtanh.f32 %v251_v53  ;;  %v255_v58 = vpop.f32.mrf.mxu0 }
  0xcf   :  { %v256_v59 = vadd.f32 %v2496_v47, %v255_v58 }
  0xd0   :  { %v1833_v60 = vpop.f32.mrf.mxu0 }
  0xd1   :  { %2086 = vtanh.f32 %v256_v59  ;;  %v271_v61 = vadd.f32 %v1833_v60, %v2496_v47 }
  0xd2   :  { %2088 = vtanh.f32 %v261_v57  ;;  %v265_v62 = vpop.f32.mrf.mxu0 }
  0xd3   :  { %v266_v63 = vadd.f32 %v2496_v47, %v265_v62 }
  0xd4   :  { %v1836_v0 = vpop.f32.mrf.mxu0 }
  0xd5   :  { %2090 = vtanh.f32 %v266_v63  ;;  %v281_v2 = vadd.f32 %v1836_v0, %v2496_v47 }
  0xd6   :  { %v2079_v1 = vpop.eup %2078  ;;  %2092 = vtanh.f32 %v271_v61  ;;  %v275_v3 = vpop.f32.mrf.mxu0 }
  0xd7   :  { %v2081_v4 = vpop.eup %2080  ;;  %v276_v5 = vadd.f32 %v2496_v47, %v275_v3  ;;  %1886 = vmatprep.mubr.msk.f32.mxu1 %vm441_vm1, %v2079_v1 }
  0xd8   :  { %v1839_v6 = vpop.f32.mrf.mxu0  ;;  %1887 = vmatmul.mubr.msk.f32.vlgmr.msra.gmra.mxu1 %vm441_vm1, %v2081_v4 }
  0xd9   :  { %2094 = vtanh.f32 %v276_v5  ;;  %v291_v8 = vadd.f32 %v1839_v6, %v2496_v47 }
  0xda   :  { %v2083_v7 = vpop.eup %2082  ;;  %2096 = vtanh.f32 %v281_v2  ;;  %v285_v9 = vpop.f32.mrf.mxu0 }
  0xdb   :  { %v2085_v10 = vpop.eup %2084  ;;  %v286_v11 = vadd.f32 %v2496_v47, %v285_v9  ;;  %1889 = vmatprep.mubr.msk.f32.mxu1 %vm441_vm1, %v2083_v7 }
  0xdc   :  { %v1842_v12 = vpop.f32.mrf.mxu0  ;;  %1890 = vmatmul.mubr.msk.f32.gmra.mxu1 %vm441_vm1, %v2085_v10 }
  0xdd   :  { %2098 = vtanh.f32 %v286_v11  ;;  %v301_v14 = vadd.f32 %v1842_v12, %v2496_v47 }
  0xde   :  { %v2087_v13 = vpop.eup %2086  ;;  %2100 = vtanh.f32 %v291_v8  ;;  %v295_v15 = vpop.f32.mrf.mxu0 }
  0xdf   :  { %v2089_v16 = vpop.eup %2088  ;;  %v296_v17 = vadd.f32 %v2496_v47, %v295_v15  ;;  %1892 = vmatprep.mubr.msk.f32.mxu1 %vm441_vm1, %v2087_v13 }
  0xe0   :  { %v1845_v18 = vpop.f32.mrf.mxu0  ;;  %1893 = vmatmul.mubr.msk.f32.gmra.mxu1 %vm441_vm1, %v2089_v16  ;;  %v796_v16 = vld [vmem:[%s2916_s5 + $0x8] sm:$0xff] }
  0xe1   :  { %2102 = vtanh.f32 %v296_v17  ;;  %v311_v20 = vadd.f32 %v1845_v18, %v2496_v47  ;;  %1946 = vmatprep.subr.mxu0 %v796_v16  ;;  %v795_v17 = vld [vmem:[%s2916_s5] sm:$0xff]  ;;  %v1170_v18 = vld [vmem:[%s2918_s7 + $0x38] sm:$0xff] }
  0xe2   :  { %v2091_v19 = vpop.eup %2090  ;;  %2104 = vtanh.f32 %v301_v14  ;;  %v305_v21 = vpop.f32.mrf.mxu0  ;;  %1947 = vmatpush3.msra.mxu0 %v796_v16  ;;  %2062 = vmatprep.subr.mxu1 %v1170_v18 }
  0xe3   :  { %v2093_v22 = vpop.eup %2092  ;;  %v306_v23 = vadd.f32 %v2496_v47, %v305_v21  ;;  %1895 = vmatprep.mubr.msk.f32.mxu1 %vm441_vm1, %v2091_v19  ;;  %1948 = vmatprep.subr.mxu0 %v795_v17  ;;  %v1169_v19 = vld [vmem:[%s2918_s7 + $0x30] sm:$0xff]  ;;  %v2580_v21 = vld [vmem:[%s2918_s7 + $0x20] sm:$0xff] }
  0xe4   :  { %v1848_v24 = vpop.f32.mrf.mxu0  ;;  %1896 = vmatmul.mubr.msk.f32.gmra.mxu1 %vm441_vm1, %v2093_v22  ;;  %1949 = vmatpush3.msra.mxu0 %v795_v17  ;;  %v2587_v22 = vld [vmem:[%s2918_s7 + $0x18] sm:$0xff] }
  0xe5   :  { %2106 = vtanh.f32 %v306_v23  ;;  %v321_v26 = vadd.f32 %v1848_v24, %v2496_v47  ;;  %1998 = vmatprep.subr.mxu0 %v1170_v18  ;;  %2070 = vmatpush3.msra.mxu1 %v1170_v18  ;;  %v2594_v23 = vld [vmem:[%s2918_s7 + $0x10] sm:$0xff]  ;;  %v2601_v24 = vld [vmem:[%s2919_s4] ss:$0 sm:$0xff] }
  0xe6   :  { %v2095_v25 = vpop.eup %2094  ;;  %2108 = vtanh.f32 %v311_v20  ;;  %v315_v27 = vpop.f32.mrf.mxu0  ;;  %2063 = vmatprep.subr.mxu1 %v1169_v19  ;;  %v1168_v20 = vld [vmem:[%s2918_s7 + $0x28] sm:$0xff] }
  0xe7   :  { %v2097_v28 = vpop.eup %2096  ;;  %v316_v29 = vadd.f32 %v2496_v47, %v315_v27  ;;  %1898 = vmatprep.mubr.msk.f32.mxu1 %vm441_vm1, %v2095_v25  ;;  %2071 = vmatpush3.msra.mxu1 %v1169_v19 }
  0xe8   :  { %v1851_v30 = vpop.f32.mrf.mxu0  ;;  %1899 = vmatmul.mubr.msk.f32.gmra.mxu1 %vm441_vm1, %v2097_v28  ;;  %2064 = vmatprep.subr.mxu1 %v1168_v20 }
  0xe9   :  { %2110 = vtanh.f32 %v316_v29  ;;  %v331_v32 = vadd.f32 %v1851_v30, %v2496_v47  ;;  %2072 = vmatpush3.msra.mxu1 %v1168_v20 }
  0xea   :  { %v2099_v31 = vpop.eup %2098  ;;  %2112 = vtanh.f32 %v321_v26  ;;  %v325_v33 = vpop.f32.mrf.mxu0  ;;  %2065 = vmatprep.subr.mxu1 %v2580_v21 }
  0xeb   :  { %v2101_v34 = vpop.eup %2100  ;;  %v326_v35 = vadd.f32 %v2496_v47, %v325_v33  ;;  %1901 = vmatprep.mubr.msk.f32.mxu1 %vm441_vm1, %v2099_v31  ;;  %2073 = vmatpush3.msra.mxu1 %v2580_v21 }
  0xec   :  { %v1854_v36 = vpop.f32.mrf.mxu0  ;;  %1902 = vmatmul.mubr.msk.f32.gmra.mxu1 %vm441_vm1, %v2101_v34  ;;  %2066 = vmatprep.subr.mxu1 %v2587_v22 }
  0xed   :  { %2114 = vtanh.f32 %v326_v35  ;;  %v341_v38 = vadd.f32 %v1854_v36, %v2496_v47  ;;  %2074 = vmatpush3.msra.mxu1 %v2587_v22 }
  0xee   :  { %v2103_v37 = vpop.eup %2102  ;;  %2116 = vtanh.f32 %v331_v32  ;;  %v335_v39 = vpop.f32.mrf.mxu0  ;;  %2067 = vmatprep.subr.mxu1 %v2594_v23 }
  0xef   :  { %v2105_v40 = vpop.eup %2104  ;;  %v336_v41 = vadd.f32 %v2496_v47, %v335_v39  ;;  %1904 = vmatprep.mubr.msk.f32.mxu1 %vm441_vm1, %v2103_v37  ;;  %2075 = vmatpush3.msra.mxu1 %v2594_v23 }
  0xf0   :  { %v1857_v42 = vpop.f32.mrf.mxu0  ;;  %1905 = vmatmul.mubr.msk.f32.gmra.mxu1 %vm441_vm1, %v2105_v40 }
  0xf1   :  { %2118 = vtanh.f32 %v336_v41  ;;  %v351_v44 = vadd.f32 %v1857_v42, %v2496_v47 }
  0xf2   :  { %v2107_v43 = vpop.eup %2106  ;;  %2120 = vtanh.f32 %v341_v38  ;;  %v345_v45 = vpop.f32.mrf.mxu0 }
  0xf3   :  { %v2109_v46 = vpop.eup %2108  ;;  %v346_v48 = vadd.f32 %v2496_v47, %v345_v45  ;;  %1907 = vmatprep.mubr.msk.f32.mxu1 %vm441_vm1, %v2107_v43 }
  0xf4   :  { %v1860_v49 = vpop.f32.mrf.mxu0  ;;  %1908 = vmatmul.mubr.msk.f32.gmra.mxu1 %vm441_vm1, %v2109_v46 }
  0xf5   :  { %2122 = vtanh.f32 %v346_v48  ;;  %v361_v51 = vadd.f32 %v1860_v49, %v2496_v47 }
  0xf6   :  { %v2111_v50 = vpop.eup %2110  ;;  %2124 = vtanh.f32 %v351_v44  ;;  %v355_v52 = vpop.f32.mrf.mxu0 }
  0xf7   :  { %v2113_v53 = vpop.eup %2112  ;;  %v356_v54 = vadd.f32 %v2496_v47, %v355_v52  ;;  %1910 = vmatprep.mubr.msk.f32.mxu1 %vm441_vm1, %v2111_v50 }
  0xf8   :  { %v1863_v55 = vpop.f32.mrf.mxu0  ;;  %1911 = vmatmul.mubr.msk.f32.gmra.mxu1 %vm441_vm1, %v2113_v53 }
  0xf9   :  { %2126 = vtanh.f32 %v356_v54  ;;  %v371_v57 = vadd.f32 %v1863_v55, %v2496_v47 }
  0xfa   :  { %v2115_v56 = vpop.eup %2114  ;;  %2128 = vtanh.f32 %v361_v51  ;;  %v365_v58 = vpop.f32.mrf.mxu0 }
  0xfb   :  { %v2117_v59 = vpop.eup %2116  ;;  %v366_v60 = vadd.f32 %v2496_v47, %v365_v58  ;;  %1913 = vmatprep.mubr.msk.f32.mxu1 %vm441_vm1, %v2115_v56 }
  0xfc   :  { %v1866_v61 = vpop.f32.mrf.mxu0  ;;  %1914 = vmatmul.mubr.msk.f32.gmra.mxu1 %vm441_vm1, %v2117_v59 }
  0xfd   :  { %2130 = vtanh.f32 %v366_v60  ;;  %v381_v63 = vadd.f32 %v1866_v61, %v2496_v47 }
  0xfe   :  { %v2119_v62 = vpop.eup %2118  ;;  %2132 = vtanh.f32 %v371_v57  ;;  %v375_v0 = vpop.f32.mrf.mxu0 }
  0xff   :  { %v2121_v1 = vpop.eup %2120  ;;  %v376_v2 = vadd.f32 %v2496_v47, %v375_v0  ;;  %1916 = vmatprep.mubr.msk.f32.mxu1 %vm441_vm1, %v2119_v62 }
 0x100   :  { %v1869_v3 = vpop.f32.mrf.mxu0  ;;  %1917 = vmatmul.mubr.msk.f32.gmra.mxu1 %vm441_vm1, %v2121_v1 }
 0x101   :  { %2134 = vtanh.f32 %v376_v2  ;;  %v391_v5 = vadd.f32 %v1869_v3, %v2496_v47 }
 0x102   :  { %v2123_v4 = vpop.eup %2122  ;;  %2136 = vtanh.f32 %v381_v63  ;;  %v385_v6 = vpop.f32.mrf.mxu0 }
 0x103   :  { %v2125_v7 = vpop.eup %2124  ;;  %v386_v8 = vadd.f32 %v2496_v47, %v385_v6  ;;  %1919 = vmatprep.mubr.msk.f32.mxu1 %vm441_vm1, %v2123_v4 }
 0x104   :  { %1920 = vmatmul.mubr.msk.f32.gmra.mxu1 %vm441_vm1, %v2125_v7 }
 0x105   :  { %2138 = vtanh.f32 %v386_v8 }
 0x106   :  { %v2127_v9 = vpop.eup %2126  ;;  %2140 = vtanh.f32 %v391_v5 }
 0x107   :  { %v2129_v10 = vpop.eup %2128  ;;  %1922 = vmatprep.mubr.msk.f32.mxu1 %vm441_vm1, %v2127_v9 }
 0x108   :  { %1923 = vmatmul.mubr.msk.f32.gmra.mxu1 %vm441_vm1, %v2129_v10 }
 0x10a   :  { %v2131_v11 = vpop.eup %2130 }
 0x10b   :  { %v2133_v12 = vpop.eup %2132  ;;  %1925 = vmatprep.mubr.msk.f32.mxu1 %vm441_vm1, %v2131_v11 }
 0x10c   :  { %1926 = vmatmul.mubr.msk.f32.gmra.mxu1 %vm441_vm1, %v2133_v12 }
 0x10e   :  { %v2135_v13 = vpop.eup %2134 }
 0x10f   :  { %v2137_v47 = vpop.eup %2136  ;;  %1928 = vmatprep.mubr.msk.f32.mxu1 %vm441_vm1, %v2135_v13 }
 0x110   :  { %1929 = vmatmul.mubr.msk.f32.gmra.mxu1 %vm441_vm1, %v2137_v47 }
 0x112   :  { %v2139_v14 = vpop.eup %2138 }
 0x113   :  { %v2141_v15 = vpop.eup %2140  ;;  %1931 = vmatprep.mubr.msk.f32.mxu1 %vm441_vm1, %v2139_v14 }
 0x114   :  { %1932 = vmatmul.mubr.msk.f32.gmra.mxu1 %vm441_vm1, %v2141_v15 }
 0x198   :  { %v1888_v25 = vpop.f32.mrf.mxu1 }
 0x199   :  { %v610_v26 = vadd.f32 %v1888_v25, %v2601_v24 }
 0x19a   :  { %v604_v27 = vpop.f32.mrf.mxu1 }
 0x19b   :  { %v605_v28 = vadd.f32 %v2601_v24, %v604_v27 }
 0x19c   :  { %v1891_v29 = vpop.f32.mrf.mxu1 }
 0x19d   :  { %2142 = vtanh.f32 %v605_v28  ;;  %v620_v30 = vadd.f32 %v1891_v29, %v2601_v24 }
 0x19e   :  { %2144 = vtanh.f32 %v610_v26  ;;  %v614_v31 = vpop.f32.mrf.mxu1 }
 0x19f   :  { %v615_v32 = vadd.f32 %v2601_v24, %v614_v31 }
 0x1a0   :  { %v1894_v33 = vpop.f32.mrf.mxu1 }
 0x1a1   :  { %2146 = vtanh.f32 %v615_v32  ;;  %v630_v34 = vadd.f32 %v1894_v33, %v2601_v24 }
 0x1a2   :  { %2148 = vtanh.f32 %v620_v30  ;;  %v624_v35 = vpop.f32.mrf.mxu1 }
 0x1a3   :  { %v625_v36 = vadd.f32 %v2601_v24, %v624_v35 }
 0x1a4   :  { %v1897_v37 = vpop.f32.mrf.mxu1 }
 0x1a5   :  { %2150 = vtanh.f32 %v625_v36  ;;  %v640_v38 = vadd.f32 %v1897_v37, %v2601_v24 }
 0x1a6   :  { %2152 = vtanh.f32 %v630_v34  ;;  %v634_v39 = vpop.f32.mrf.mxu1 }
 0x1a7   :  { %v635_v40 = vadd.f32 %v2601_v24, %v634_v39 }
 0x1a8   :  { %v1900_v41 = vpop.f32.mrf.mxu1 }
 0x1a9   :  { %2154 = vtanh.f32 %v635_v40  ;;  %v650_v43 = vadd.f32 %v1900_v41, %v2601_v24 }
 0x1aa   :  { %v2143_v42 = vpop.eup %2142  ;;  %2156 = vtanh.f32 %v640_v38  ;;  %v644_v44 = vpop.f32.mrf.mxu1 }
 0x1ab   :  { %v2145_v45 = vpop.eup %2144  ;;  %v645_v46 = vadd.f32 %v2601_v24, %v644_v44  ;;  %1950 = vmatprep.mubr.msk.f32.mxu0 %vm441_vm1, %v2143_v42 }
 0x1ac   :  { %v1903_v48 = vpop.f32.mrf.mxu1  ;;  %1951 = vmatmul.mubr.msk.f32.vlgmr.msra.gmra.mxu0 %vm441_vm1, %v2145_v45 }
 0x1ad   :  { %2158 = vtanh.f32 %v645_v46  ;;  %1999 = vmatpush3.msra.mxu0 %v1170_v18  ;;  %v660_v50 = vadd.f32 %v1903_v48, %v2601_v24 }
 0x1ae   :  { %v2147_v49 = vpop.eup %2146  ;;  %2160 = vtanh.f32 %v650_v43  ;;  %v654_v51 = vpop.f32.mrf.mxu1  ;;  %2000 = vmatprep.subr.mxu0 %v1169_v19 }
 0x1af   :  { %v2149_v52 = vpop.eup %2148  ;;  %v655_v53 = vadd.f32 %v2601_v24, %v654_v51  ;;  %1953 = vmatprep.mubr.msk.f32.mxu0 %vm441_vm1, %v2147_v49  ;;  %2001 = vmatpush3.msra.mxu0 %v1169_v19 }
 0x1b0   :  { %v1906_v54 = vpop.f32.mrf.mxu1  ;;  %1954 = vmatmul.mubr.msk.f32.gmra.mxu0 %vm441_vm1, %v2149_v52  ;;  %2002 = vmatprep.subr.mxu0 %v1168_v20 }
 0x1b1   :  { %2162 = vtanh.f32 %v655_v53  ;;  %2003 = vmatpush3.msra.mxu0 %v1168_v20  ;;  %v670_v56 = vadd.f32 %v1906_v54, %v2601_v24 }
 0x1b2   :  { %v2151_v55 = vpop.eup %2150  ;;  %2164 = vtanh.f32 %v660_v50  ;;  %v664_v57 = vpop.f32.mrf.mxu1  ;;  %2004 = vmatprep.subr.mxu0 %v2580_v21 }
 0x1b3   :  { %v2153_v58 = vpop.eup %2152  ;;  %v665_v59 = vadd.f32 %v2601_v24, %v664_v57  ;;  %1956 = vmatprep.mubr.msk.f32.mxu0 %vm441_vm1, %v2151_v55  ;;  %2005 = vmatpush3.msra.mxu0 %v2580_v21 }
 0x1b4   :  { %v1909_v60 = vpop.f32.mrf.mxu1  ;;  %1957 = vmatmul.mubr.msk.f32.gmra.mxu0 %vm441_vm1, %v2153_v58  ;;  %2006 = vmatprep.subr.mxu0 %v2587_v22  ;;  %v1164_v58 = vld [vmem:[%s2918_s7 + $0x8] sm:$0xff] }
 0x1b5   :  { %2166 = vtanh.f32 %v665_v59  ;;  %2007 = vmatpush3.msra.mxu0 %v2587_v22  ;;  %v680_v62 = vadd.f32 %v1909_v60, %v2601_v24  ;;  %2068 = vmatprep.subr.mxu1 %v1164_v58  ;;  %v1163_v59 = vld [vmem:[%s2918_s7] sm:$0xff] }
 0x1b6   :  { %v2155_v61 = vpop.eup %2154  ;;  %2168 = vtanh.f32 %v670_v56  ;;  %v674_v63 = vpop.f32.mrf.mxu1  ;;  %2008 = vmatprep.subr.mxu0 %v2594_v23  ;;  %2076 = vmatpush3.msra.mxu1 %v1164_v58  ;;  %v2682_v60 = vld [vmem:[%s2920_s6] ss:$0 sm:$0xff] }
 0x1b7   :  { %v2157_v0 = vpop.eup %2156  ;;  %v675_v1 = vadd.f32 %v2601_v24, %v674_v63  ;;  %1959 = vmatprep.mubr.msk.f32.mxu0 %vm441_vm1, %v2155_v61  ;;  %2009 = vmatpush3.msra.mxu0 %v2594_v23 }
 0x1b8   :  { %v1912_v2 = vpop.f32.mrf.mxu1  ;;  %1960 = vmatmul.mubr.msk.f32.gmra.mxu0 %vm441_vm1, %v2157_v0  ;;  %2010 = vmatprep.subr.mxu0 %v1164_v58 }
 0x1b9   :  { %2170 = vtanh.f32 %v675_v1  ;;  %v690_v4 = vadd.f32 %v1912_v2, %v2601_v24  ;;  %2011 = vmatpush3.msra.mxu0 %v1164_v58  ;;  %2069 = vmatprep.subr.mxu1 %v1163_v59 }
 0x1ba   :  { %v2159_v3 = vpop.eup %2158  ;;  %2172 = vtanh.f32 %v680_v62  ;;  %v684_v5 = vpop.f32.mrf.mxu1  ;;  %2012 = vmatprep.subr.mxu0 %v1163_v59  ;;  %2077 = vmatpush3.msra.mxu1 %v1163_v59 }
 0x1bb   :  { %v2161_v6 = vpop.eup %2160  ;;  %v685_v7 = vadd.f32 %v2601_v24, %v684_v5  ;;  %1962 = vmatprep.mubr.msk.f32.mxu0 %vm441_vm1, %v2159_v3  ;;  %2013 = vmatpush3.msra.mxu0 %v1163_v59 }
 0x1bc   :  { %v1915_v8 = vpop.f32.mrf.mxu1  ;;  %1963 = vmatmul.mubr.msk.f32.gmra.mxu0 %vm441_vm1, %v2161_v6 }
 0x1bd   :  { %2174 = vtanh.f32 %v685_v7  ;;  %v700_v10 = vadd.f32 %v1915_v8, %v2601_v24 }
 0x1be   :  { %v2163_v9 = vpop.eup %2162  ;;  %2176 = vtanh.f32 %v690_v4  ;;  %v694_v11 = vpop.f32.mrf.mxu1 }
 0x1bf   :  { %v2165_v12 = vpop.eup %2164  ;;  %v695_v13 = vadd.f32 %v2601_v24, %v694_v11  ;;  %1965 = vmatprep.mubr.msk.f32.mxu0 %vm441_vm1, %v2163_v9 }
 0x1c0   :  { %v1918_v47 = vpop.f32.mrf.mxu1  ;;  %1966 = vmatmul.mubr.msk.f32.gmra.mxu0 %vm441_vm1, %v2165_v12 }
 0x1c1   :  { %2178 = vtanh.f32 %v695_v13  ;;  %v710_v15 = vadd.f32 %v1918_v47, %v2601_v24 }
 0x1c2   :  { %v2167_v14 = vpop.eup %2166  ;;  %2180 = vtanh.f32 %v700_v10  ;;  %v704_v16 = vpop.f32.mrf.mxu1 }
 0x1c3   :  { %v2169_v17 = vpop.eup %2168  ;;  %v705_v18 = vadd.f32 %v2601_v24, %v704_v16  ;;  %1968 = vmatprep.mubr.msk.f32.mxu0 %vm441_vm1, %v2167_v14 }
 0x1c4   :  { %v1921_v19 = vpop.f32.mrf.mxu1  ;;  %1969 = vmatmul.mubr.msk.f32.gmra.mxu0 %vm441_vm1, %v2169_v17 }
 0x1c5   :  { %2182 = vtanh.f32 %v705_v18  ;;  %v720_v21 = vadd.f32 %v1921_v19, %v2601_v24 }
 0x1c6   :  { %v2171_v20 = vpop.eup %2170  ;;  %2184 = vtanh.f32 %v710_v15  ;;  %v714_v22 = vpop.f32.mrf.mxu1 }
 0x1c7   :  { %v2173_v23 = vpop.eup %2172  ;;  %v715_v25 = vadd.f32 %v2601_v24, %v714_v22  ;;  %1971 = vmatprep.mubr.msk.f32.mxu0 %vm441_vm1, %v2171_v20 }
 0x1c8   :  { %v1924_v26 = vpop.f32.mrf.mxu1  ;;  %1972 = vmatmul.mubr.msk.f32.gmra.mxu0 %vm441_vm1, %v2173_v23 }
 0x1c9   :  { %2186 = vtanh.f32 %v715_v25  ;;  %v730_v28 = vadd.f32 %v1924_v26, %v2601_v24 }
 0x1ca   :  { %v2175_v27 = vpop.eup %2174  ;;  %2188 = vtanh.f32 %v720_v21  ;;  %v724_v29 = vpop.f32.mrf.mxu1 }
 0x1cb   :  { %v2177_v30 = vpop.eup %2176  ;;  %v725_v31 = vadd.f32 %v2601_v24, %v724_v29  ;;  %1974 = vmatprep.mubr.msk.f32.mxu0 %vm441_vm1, %v2175_v27 }
 0x1cc   :  { %v1927_v32 = vpop.f32.mrf.mxu1  ;;  %1975 = vmatmul.mubr.msk.f32.gmra.mxu0 %vm441_vm1, %v2177_v30 }
 0x1cd   :  { %2190 = vtanh.f32 %v725_v31  ;;  %v740_v34 = vadd.f32 %v1927_v32, %v2601_v24 }
 0x1ce   :  { %v2179_v33 = vpop.eup %2178  ;;  %2192 = vtanh.f32 %v730_v28  ;;  %v734_v35 = vpop.f32.mrf.mxu1 }
 0x1cf   :  { %v2181_v36 = vpop.eup %2180  ;;  %v735_v37 = vadd.f32 %v2601_v24, %v734_v35  ;;  %1977 = vmatprep.mubr.msk.f32.mxu0 %vm441_vm1, %v2179_v33 }
 0x1d0   :  { %v1930_v38 = vpop.f32.mrf.mxu1  ;;  %1978 = vmatmul.mubr.msk.f32.gmra.mxu0 %vm441_vm1, %v2181_v36 }
 0x1d1   :  { %2194 = vtanh.f32 %v735_v37  ;;  %v750_v40 = vadd.f32 %v1930_v38, %v2601_v24 }
 0x1d2   :  { %v2183_v39 = vpop.eup %2182  ;;  %2196 = vtanh.f32 %v740_v34  ;;  %v744_v41 = vpop.f32.mrf.mxu1 }
 0x1d3   :  { %v2185_v42 = vpop.eup %2184  ;;  %v745_v43 = vadd.f32 %v2601_v24, %v744_v41  ;;  %1980 = vmatprep.mubr.msk.f32.mxu0 %vm441_vm1, %v2183_v39 }
 0x1d4   :  { %v1933_v44 = vpop.f32.mrf.mxu1  ;;  %1981 = vmatmul.mubr.msk.f32.gmra.mxu0 %vm441_vm1, %v2185_v42 }
 0x1d5   :  { %2198 = vtanh.f32 %v745_v43  ;;  %v760_v46 = vadd.f32 %v1933_v44, %v2601_v24 }
 0x1d6   :  { %v2187_v45 = vpop.eup %2186  ;;  %2200 = vtanh.f32 %v750_v40  ;;  %v754_v48 = vpop.f32.mrf.mxu1 }
 0x1d7   :  { %v2189_v49 = vpop.eup %2188  ;;  %v755_v50 = vadd.f32 %v2601_v24, %v754_v48  ;;  %1983 = vmatprep.mubr.msk.f32.mxu0 %vm441_vm1, %v2187_v45 }
 0x1d8   :  { %1984 = vmatmul.mubr.msk.f32.gmra.mxu0 %vm441_vm1, %v2189_v49 }
 0x1d9   :  { %2202 = vtanh.f32 %v755_v50 }
 0x1da   :  { %v2191_v51 = vpop.eup %2190  ;;  %2204 = vtanh.f32 %v760_v46 }
 0x1db   :  { %v2193_v52 = vpop.eup %2192  ;;  %1986 = vmatprep.mubr.msk.f32.mxu0 %vm441_vm1, %v2191_v51 }
 0x1dc   :  { %1987 = vmatmul.mubr.msk.f32.gmra.mxu0 %vm441_vm1, %v2193_v52 }
 0x1de   :  { %v2195_v53 = vpop.eup %2194 }
 0x1df   :  { %v2197_v54 = vpop.eup %2196  ;;  %1989 = vmatprep.mubr.msk.f32.mxu0 %vm441_vm1, %v2195_v53 }
 0x1e0   :  { %1990 = vmatmul.mubr.msk.f32.gmra.mxu0 %vm441_vm1, %v2197_v54 }
 0x1e2   :  { %v2199_v55 = vpop.eup %2198 }
 0x1e3   :  { %v2201_v24 = vpop.eup %2200  ;;  %1992 = vmatprep.mubr.msk.f32.mxu0 %vm441_vm1, %v2199_v55 }
 0x1e4   :  { %1993 = vmatmul.mubr.msk.f32.gmra.mxu0 %vm441_vm1, %v2201_v24 }
 0x1e6   :  { %v2203_v56 = vpop.eup %2202 }
 0x1e7   :  { %v2205_v57 = vpop.eup %2204  ;;  %1995 = vmatprep.mubr.msk.f32.mxu0 %vm441_vm1, %v2203_v56 }
 0x1e8   :  { %1996 = vmatmul.mubr.msk.f32.gmra.mxu0 %vm441_vm1, %v2205_v57 }
 0x26c   :  { %v1952_v61 = vpop.f32.mrf.mxu0 }
 0x26d   :  { %v978_v62 = vadd.f32 %v1952_v61, %v2682_v60 }
 0x26e   :  { %v972_v63 = vpop.f32.mrf.mxu0 }
 0x26f   :  { %v973_v0 = vadd.f32 %v2682_v60, %v972_v63 }
 0x270   :  { %v1955_v1 = vpop.f32.mrf.mxu0 }
 0x271   :  { %2206 = vtanh.f32 %v973_v0  ;;  %v988_v2 = vadd.f32 %v1955_v1, %v2682_v60 }
 0x272   :  { %2208 = vtanh.f32 %v978_v62  ;;  %v982_v3 = vpop.f32.mrf.mxu0 }
 0x273   :  { %v983_v4 = vadd.f32 %v2682_v60, %v982_v3 }
 0x274   :  { %v1958_v5 = vpop.f32.mrf.mxu0 }
 0x275   :  { %2210 = vtanh.f32 %v983_v4  ;;  %v998_v6 = vadd.f32 %v1958_v5, %v2682_v60 }
 0x276   :  { %2212 = vtanh.f32 %v988_v2  ;;  %v992_v7 = vpop.f32.mrf.mxu0 }
 0x277   :  { %v993_v8 = vadd.f32 %v2682_v60, %v992_v7 }
 0x278   :  { %v1961_v9 = vpop.f32.mrf.mxu0 }
 0x279   :  { %2214 = vtanh.f32 %v993_v8  ;;  %v1008_v10 = vadd.f32 %v1961_v9, %v2682_v60 }
 0x27a   :  { %2216 = vtanh.f32 %v998_v6  ;;  %v1002_v11 = vpop.f32.mrf.mxu0 }
 0x27b   :  { %v1003_v12 = vadd.f32 %v2682_v60, %v1002_v11 }
 0x27c   :  { %v1964_v13 = vpop.f32.mrf.mxu0 }
 0x27d   :  { %2218 = vtanh.f32 %v1003_v12  ;;  %v1018_v14 = vadd.f32 %v1964_v13, %v2682_v60 }
 0x27e   :  { %v2207_v47 = vpop.eup %2206  ;;  %2220 = vtanh.f32 %v1008_v10  ;;  %v1012_v15 = vpop.f32.mrf.mxu0 }
 0x27f   :  { %v2209_v16 = vpop.eup %2208  ;;  %v1013_v17 = vadd.f32 %v2682_v60, %v1012_v15  ;;  %2014 = vmatprep.mubr.msk.f32.mxu0 %vm441_vm1, %v2207_v47 }
 0x280   :  { %v1967_v18 = vpop.f32.mrf.mxu0  ;;  %2015 = vmatmul.mubr.msk.f32.vlgmr.msra.gmra.mxu0 %vm441_vm1, %v2209_v16 }
 0x281   :  { %2222 = vtanh.f32 %v1013_v17  ;;  %v1028_v20 = vadd.f32 %v1967_v18, %v2682_v60 }
 0x282   :  { %v2211_v19 = vpop.eup %2210  ;;  %2224 = vtanh.f32 %v1018_v14  ;;  %v1022_v21 = vpop.f32.mrf.mxu0 }
 0x283   :  { %v2213_v22 = vpop.eup %2212  ;;  %v1023_v23 = vadd.f32 %v2682_v60, %v1022_v21  ;;  %2017 = vmatprep.mubr.msk.f32.mxu1 %vm441_vm1, %v2211_v19 }
 0x284   :  { %v1970_v25 = vpop.f32.mrf.mxu0  ;;  %2018 = vmatmul.mubr.msk.f32.vlgmr.msra.gmra.mxu1 %vm441_vm1, %v2213_v22 }
 0x285   :  { %2226 = vtanh.f32 %v1023_v23  ;;  %v1038_v27 = vadd.f32 %v1970_v25, %v2682_v60 }
 0x286   :  { %v2215_v26 = vpop.eup %2214  ;;  %2228 = vtanh.f32 %v1028_v20  ;;  %v1032_v28 = vpop.f32.mrf.mxu0 }
 0x287   :  { %v2217_v29 = vpop.eup %2216  ;;  %v1033_v30 = vadd.f32 %v2682_v60, %v1032_v28  ;;  %2020 = vmatprep.mubr.msk.f32.mxu1 %vm441_vm1, %v2215_v26 }
 0x288   :  { %v1973_v31 = vpop.f32.mrf.mxu0  ;;  %2021 = vmatmul.mubr.msk.f32.gmra.mxu1 %vm441_vm1, %v2217_v29  ;;  %v2751_v29 = vld [vmem:[%s2921_s8] ss:$0 sm:$0xff] }
 0x289   :  { %2230 = vtanh.f32 %v1033_v30  ;;  %v1048_v33 = vadd.f32 %v1973_v31, %v2682_v60 }
 0x28a   :  { %v2219_v32 = vpop.eup %2218  ;;  %2232 = vtanh.f32 %v1038_v27  ;;  %v1042_v34 = vpop.f32.mrf.mxu0 }
 0x28b   :  { %v2221_v35 = vpop.eup %2220  ;;  %v1043_v36 = vadd.f32 %v2682_v60, %v1042_v34  ;;  %2023 = vmatprep.mubr.msk.f32.mxu1 %vm441_vm1, %v2219_v32 }
 0x28c   :  { %v1976_v37 = vpop.f32.mrf.mxu0  ;;  %2024 = vmatmul.mubr.msk.f32.gmra.mxu1 %vm441_vm1, %v2221_v35 }
 0x28d   :  { %2234 = vtanh.f32 %v1043_v36  ;;  %v1058_v39 = vadd.f32 %v1976_v37, %v2682_v60 }
 0x28e   :  { %v2223_v38 = vpop.eup %2222  ;;  %2236 = vtanh.f32 %v1048_v33  ;;  %v1052_v40 = vpop.f32.mrf.mxu0 }
 0x28f   :  { %v2225_v41 = vpop.eup %2224  ;;  %v1053_v42 = vadd.f32 %v2682_v60, %v1052_v40  ;;  %2026 = vmatprep.mubr.msk.f32.mxu1 %vm441_vm1, %v2223_v38 }
 0x290   :  { %v1979_v43 = vpop.f32.mrf.mxu0  ;;  %2027 = vmatmul.mubr.msk.f32.gmra.mxu1 %vm441_vm1, %v2225_v41 }
 0x291   :  { %2238 = vtanh.f32 %v1053_v42  ;;  %v1068_v45 = vadd.f32 %v1979_v43, %v2682_v60 }
 0x292   :  { %v2227_v44 = vpop.eup %2226  ;;  %2240 = vtanh.f32 %v1058_v39  ;;  %v1062_v46 = vpop.f32.mrf.mxu0 }
 0x293   :  { %v2229_v48 = vpop.eup %2228  ;;  %v1063_v49 = vadd.f32 %v2682_v60, %v1062_v46  ;;  %2029 = vmatprep.mubr.msk.f32.mxu1 %vm441_vm1, %v2227_v44 }
 0x294   :  { %v1982_v50 = vpop.f32.mrf.mxu0  ;;  %2030 = vmatmul.mubr.msk.f32.gmra.mxu1 %vm441_vm1, %v2229_v48 }
 0x295   :  { %2242 = vtanh.f32 %v1063_v49  ;;  %v1078_v52 = vadd.f32 %v1982_v50, %v2682_v60 }
 0x296   :  { %v2231_v51 = vpop.eup %2230  ;;  %2244 = vtanh.f32 %v1068_v45  ;;  %v1072_v53 = vpop.f32.mrf.mxu0 }
 0x297   :  { %v2233_v54 = vpop.eup %2232  ;;  %v1073_v55 = vadd.f32 %v2682_v60, %v1072_v53  ;;  %2032 = vmatprep.mubr.msk.f32.mxu1 %vm441_vm1, %v2231_v51 }
 0x298   :  { %v1985_v24 = vpop.f32.mrf.mxu0  ;;  %2033 = vmatmul.mubr.msk.f32.gmra.mxu1 %vm441_vm1, %v2233_v54 }
 0x299   :  { %2246 = vtanh.f32 %v1073_v55  ;;  %v1088_v57 = vadd.f32 %v1985_v24, %v2682_v60 }
 0x29a   :  { %v2235_v56 = vpop.eup %2234  ;;  %2248 = vtanh.f32 %v1078_v52  ;;  %v1082_v58 = vpop.f32.mrf.mxu0 }
 0x29b   :  { %v2237_v59 = vpop.eup %2236  ;;  %v1083_v61 = vadd.f32 %v2682_v60, %v1082_v58  ;;  %2035 = vmatprep.mubr.msk.f32.mxu1 %vm441_vm1, %v2235_v56 }
 0x29c   :  { %v1988_v62 = vpop.f32.mrf.mxu0  ;;  %2036 = vmatmul.mubr.msk.f32.gmra.mxu1 %vm441_vm1, %v2237_v59 }
 0x29d   :  { %2250 = vtanh.f32 %v1083_v61  ;;  %v1098_v0 = vadd.f32 %v1988_v62, %v2682_v60 }
 0x29e   :  { %v2239_v63 = vpop.eup %2238  ;;  %2252 = vtanh.f32 %v1088_v57  ;;  %v1092_v1 = vpop.f32.mrf.mxu0 }
 0x29f   :  { %v2241_v2 = vpop.eup %2240  ;;  %v1093_v3 = vadd.f32 %v2682_v60, %v1092_v1  ;;  %2038 = vmatprep.mubr.msk.f32.mxu1 %vm441_vm1, %v2239_v63 }
 0x2a0   :  { %v1991_v4 = vpop.f32.mrf.mxu0  ;;  %2039 = vmatmul.mubr.msk.f32.gmra.mxu1 %vm441_vm1, %v2241_v2 }
 0x2a1   :  { %2254 = vtanh.f32 %v1093_v3  ;;  %v1108_v6 = vadd.f32 %v1991_v4, %v2682_v60 }
 0x2a2   :  { %v2243_v5 = vpop.eup %2242  ;;  %2256 = vtanh.f32 %v1098_v0  ;;  %v1102_v7 = vpop.f32.mrf.mxu0 }
 0x2a3   :  { %v2245_v8 = vpop.eup %2244  ;;  %v1103_v9 = vadd.f32 %v2682_v60, %v1102_v7  ;;  %2041 = vmatprep.mubr.msk.f32.mxu1 %vm441_vm1, %v2243_v5 }
 0x2a4   :  { %v1994_v10 = vpop.f32.mrf.mxu0  ;;  %2042 = vmatmul.mubr.msk.f32.gmra.mxu1 %vm441_vm1, %v2245_v8 }
 0x2a5   :  { %2258 = vtanh.f32 %v1103_v9  ;;  %v1118_v12 = vadd.f32 %v1994_v10, %v2682_v60 }
 0x2a6   :  { %v2247_v11 = vpop.eup %2246  ;;  %2260 = vtanh.f32 %v1108_v6  ;;  %v1112_v13 = vpop.f32.mrf.mxu0 }
 0x2a7   :  { %v2249_v47 = vpop.eup %2248  ;;  %v1113_v14 = vadd.f32 %v2682_v60, %v1112_v13  ;;  %2044 = vmatprep.mubr.msk.f32.mxu1 %vm441_vm1, %v2247_v11 }
 0x2a8   :  { %v1997_v15 = vpop.f32.mrf.mxu0  ;;  %2045 = vmatmul.mubr.msk.f32.gmra.mxu1 %vm441_vm1, %v2249_v47 }
 0x2a9   :  { %2262 = vtanh.f32 %v1113_v14  ;;  %v1128_v17 = vadd.f32 %v1997_v15, %v2682_v60 }
 0x2aa   :  { %v2251_v16 = vpop.eup %2250  ;;  %2264 = vtanh.f32 %v1118_v12  ;;  %v1122_v18 = vpop.f32.mrf.mxu0 }
 0x2ab   :  { %v2253_v19 = vpop.eup %2252  ;;  %v1123_v20 = vadd.f32 %v2682_v60, %v1122_v18  ;;  %2047 = vmatprep.mubr.msk.f32.mxu1 %vm441_vm1, %v2251_v16 }
 0x2ac   :  { %2048 = vmatmul.mubr.msk.f32.gmra.mxu1 %vm441_vm1, %v2253_v19 }
 0x2ad   :  { %2266 = vtanh.f32 %v1123_v20 }
 0x2ae   :  { %v2255_v21 = vpop.eup %2254  ;;  %2268 = vtanh.f32 %v1128_v17 }
 0x2af   :  { %v2257_v22 = vpop.eup %2256  ;;  %2050 = vmatprep.mubr.msk.f32.mxu1 %vm441_vm1, %v2255_v21 }
 0x2b0   :  { %2051 = vmatmul.mubr.msk.f32.gmra.mxu1 %vm441_vm1, %v2257_v22 }
 0x2b2   :  { %v2259_v23 = vpop.eup %2258 }
 0x2b3   :  { %v2261_v25 = vpop.eup %2260  ;;  %2053 = vmatprep.mubr.msk.f32.mxu1 %vm441_vm1, %v2259_v23 }
 0x2b4   :  { %2054 = vmatmul.mubr.msk.f32.gmra.mxu1 %vm441_vm1, %v2261_v25 }
 0x2b6   :  { %v2263_v26 = vpop.eup %2262 }
 0x2b7   :  { %v2265_v60 = vpop.eup %2264  ;;  %2056 = vmatprep.mubr.msk.f32.mxu1 %vm441_vm1, %v2263_v26 }
 0x2b8   :  { %2057 = vmatmul.mubr.msk.f32.gmra.mxu1 %vm441_vm1, %v2265_v60 }
 0x2ba   :  { %v2267_v27 = vpop.eup %2266 }
 0x2bb   :  { %v2269_v28 = vpop.eup %2268  ;;  %2059 = vmatprep.mubr.msk.f32.mxu1 %vm441_vm1, %v2267_v27 }
 0x2bc   :  { %2060 = vmatmul.mubr.msk.f32.gmra.mxu1 %vm441_vm1, %v2269_v28 }
 0x340   :  { %v2016_v30 = vpop.f32.mrf.mxu0 }
 0x341   :  { %v1346_v31 = vadd.f32 %v2016_v30, %v2751_v29 }
 0x342   :  { %v1340_v32 = vpop.f32.mrf.mxu0 }
 0x343   :  { %1500 = vst.msk [vmem:[%s2922_s9 + $0x8] sm:$0xff] %vm72_vm0, %v1346_v31  ;;  %v1341_v33 = vadd.f32 %v2751_v29, %v1340_v32 }
 0x344   :  { %v2019_v34 = vpop.f32.mrf.mxu1 }
 0x345   :  { %1499 = vst.msk [vmem:[%s2922_s9] sm:$0xff] %vm72_vm0, %v1341_v33  ;;  %v1356_v35 = vadd.f32 %v2019_v34, %v2751_v29 }
 0x346   :  { %v1350_v36 = vpop.f32.mrf.mxu1 }
 0x347   :  { %1502 = vst.msk [vmem:[%s2922_s9 + $0x18] sm:$0xff] %vm72_vm0, %v1356_v35  ;;  %v1351_v37 = vadd.f32 %v2751_v29, %v1350_v36 }
 0x348   :  { %v2022_v38 = vpop.f32.mrf.mxu1 }
 0x349   :  { %1501 = vst.msk [vmem:[%s2922_s9 + $0x10] sm:$0xff] %vm72_vm0, %v1351_v37  ;;  %v1366_v39 = vadd.f32 %v2022_v38, %v2751_v29 }
 0x34a   :  { %v1360_v40 = vpop.f32.mrf.mxu1 }
 0x34b   :  { %1504 = vst.msk [vmem:[%s2922_s9 + $0x28] sm:$0xff] %vm72_vm0, %v1366_v39  ;;  %v1361_v41 = vadd.f32 %v2751_v29, %v1360_v40 }
 0x34c   :  { %v2025_v42 = vpop.f32.mrf.mxu1 }
 0x34d   :  { %1503 = vst.msk [vmem:[%s2922_s9 + $0x20] sm:$0xff] %vm72_vm0, %v1361_v41  ;;  %v1376_v43 = vadd.f32 %v2025_v42, %v2751_v29 }
 0x34e   :  { %v1370_v44 = vpop.f32.mrf.mxu1 }
 0x34f   :  { %1506 = vst.msk [vmem:[%s2922_s9 + $0x38] sm:$0xff] %vm72_vm0, %v1376_v43  ;;  %v1371_v45 = vadd.f32 %v2751_v29, %v1370_v44 }
 0x350   :  { %v2028_v46 = vpop.f32.mrf.mxu1 }
 0x351   :  { %1505 = vst.msk [vmem:[%s2922_s9 + $0x30] sm:$0xff] %vm72_vm0, %v1371_v45  ;;  %v1386_v48 = vadd.f32 %v2028_v46, %v2751_v29 }
 0x352   :  { %v1380_v49 = vpop.f32.mrf.mxu1 }
 0x353   :  { %1508 = vst.msk [vmem:[%s2922_s9 + $0x48] sm:$0xff] %vm72_vm0, %v1386_v48  ;;  %v1381_v50 = vadd.f32 %v2751_v29, %v1380_v49 }
 0x354   :  { %v2031_v51 = vpop.f32.mrf.mxu1 }
 0x355   :  { %1507 = vst.msk [vmem:[%s2922_s9 + $0x40] sm:$0xff] %vm72_vm0, %v1381_v50  ;;  %v1396_v52 = vadd.f32 %v2031_v51, %v2751_v29 }
 0x356   :  { %v1390_v53 = vpop.f32.mrf.mxu1 }
 0x357   :  { %1510 = vst.msk [vmem:[%s2922_s9 + $0x58] sm:$0xff] %vm72_vm0, %v1396_v52  ;;  %v1391_v54 = vadd.f32 %v2751_v29, %v1390_v53 }
 0x358   :  { %v2034_v55 = vpop.f32.mrf.mxu1 }
 0x359   :  { %1509 = vst.msk [vmem:[%s2922_s9 + $0x50] sm:$0xff] %vm72_vm0, %v1391_v54  ;;  %v1406_v24 = vadd.f32 %v2034_v55, %v2751_v29 }
 0x35a   :  { %v1400_v56 = vpop.f32.mrf.mxu1 }
 0x35b   :  { %1512 = vst.msk [vmem:[%s2922_s9 + $0x68] sm:$0xff] %vm72_vm0, %v1406_v24  ;;  %v1401_v57 = vadd.f32 %v2751_v29, %v1400_v56 }
 0x35c   :  { %v2037_v58 = vpop.f32.mrf.mxu1 }
 0x35d   :  { %1511 = vst.msk [vmem:[%s2922_s9 + $0x60] sm:$0xff] %vm72_vm0, %v1401_v57  ;;  %v1416_v59 = vadd.f32 %v2037_v58, %v2751_v29 }
 0x35e   :  { %v1410_v61 = vpop.f32.mrf.mxu1 }
 0x35f   :  { %1514 = vst.msk [vmem:[%s2922_s9 + $0x78] sm:$0xff] %vm72_vm0, %v1416_v59  ;;  %v1411_v62 = vadd.f32 %v2751_v29, %v1410_v61 }
 0x360   :  { %v2040_v63 = vpop.f32.mrf.mxu1 }
 0x361   :  { %1513 = vst.msk [vmem:[%s2922_s9 + $0x70] sm:$0xff] %vm72_vm0, %v1411_v62  ;;  %v1426_v0 = vadd.f32 %v2040_v63, %v2751_v29 }
 0x362   :  { %v1420_v1 = vpop.f32.mrf.mxu1 }
 0x363   :  { %1516 = vst.msk [vmem:[%s2922_s9 + $0x88] sm:$0xff] %vm72_vm0, %v1426_v0  ;;  %v1421_v2 = vadd.f32 %v2751_v29, %v1420_v1 }
 0x364   :  { %v2043_v3 = vpop.f32.mrf.mxu1 }
 0x365   :  { %1515 = vst.msk [vmem:[%s2922_s9 + $0x80] sm:$0xff] %vm72_vm0, %v1421_v2  ;;  %v1436_v4 = vadd.f32 %v2043_v3, %v2751_v29 }
 0x366   :  { %v1430_v5 = vpop.f32.mrf.mxu1 }
 0x367   :  { %1518 = vst.msk [vmem:[%s2922_s9 + $0x98] sm:$0xff] %vm72_vm0, %v1436_v4  ;;  %v1431_v6 = vadd.f32 %v2751_v29, %v1430_v5 }
 0x368   :  { %v2046_v7 = vpop.f32.mrf.mxu1 }
 0x369   :  { %1517 = vst.msk [vmem:[%s2922_s9 + $0x90] sm:$0xff] %vm72_vm0, %v1431_v6  ;;  %v1446_v8 = vadd.f32 %v2046_v7, %v2751_v29 }
 0x36a   :  { %v1440_v9 = vpop.f32.mrf.mxu1 }
 0x36b   :  { %1520 = vst.msk [vmem:[%s2922_s9 + $0xa8] sm:$0xff] %vm72_vm0, %v1446_v8  ;;  %v1441_v10 = vadd.f32 %v2751_v29, %v1440_v9 }
 0x36c   :  { %v2049_v11 = vpop.f32.mrf.mxu1 }
 0x36d   :  { %1519 = vst.msk [vmem:[%s2922_s9 + $0xa0] sm:$0xff] %vm72_vm0, %v1441_v10  ;;  %v1456_v12 = vadd.f32 %v2049_v11, %v2751_v29 }
 0x36e   :  { %v1450_v13 = vpop.f32.mrf.mxu1 }
 0x36f   :  { %1522 = vst.msk [vmem:[%s2922_s9 + $0xb8] sm:$0xff] %vm72_vm0, %v1456_v12  ;;  %v1451_v47 = vadd.f32 %v2751_v29, %v1450_v13 }
 0x370   :  { %v2052_v14 = vpop.f32.mrf.mxu1 }
 0x371   :  { %1521 = vst.msk [vmem:[%s2922_s9 + $0xb0] sm:$0xff] %vm72_vm0, %v1451_v47  ;;  %v1466_v15 = vadd.f32 %v2052_v14, %v2751_v29 }
 0x372   :  { %v1460_v16 = vpop.f32.mrf.mxu1 }
 0x373   :  { %1524 = vst.msk [vmem:[%s2922_s9 + $0xc8] sm:$0xff] %vm72_vm0, %v1466_v15  ;;  %v1461_v17 = vadd.f32 %v2751_v29, %v1460_v16 }
 0x374   :  { %v2055_v18 = vpop.f32.mrf.mxu1 }
 0x375   :  { %1523 = vst.msk [vmem:[%s2922_s9 + $0xc0] sm:$0xff] %vm72_vm0, %v1461_v17  ;;  %v1476_v19 = vadd.f32 %v2055_v18, %v2751_v29 }
 0x376   :  { %v1470_v20 = vpop.f32.mrf.mxu1 }
 0x377   :  { %1526 = vst.msk [vmem:[%s2922_s9 + $0xd8] sm:$0xff] %vm72_vm0, %v1476_v19  ;;  %v1471_v21 = vadd.f32 %v2751_v29, %v1470_v20 }
 0x378   :  { %v2058_v22 = vpop.f32.mrf.mxu1 }
 0x379   :  { %1525 = vst.msk [vmem:[%s2922_s9 + $0xd0] sm:$0xff] %vm72_vm0, %v1471_v21  ;;  %v1486_v23 = vadd.f32 %v2058_v22, %v2751_v29 }
 0x37a   :  { %v1480_v25 = vpop.f32.mrf.mxu1 }
 0x37b   :  { %1528 = vst.msk [vmem:[%s2922_s9 + $0xe8] sm:$0xff] %vm72_vm0, %v1486_v23  ;;  %v1481_v26 = vadd.f32 %v2751_v29, %v1480_v25 }
 0x37c   :  { %v2061_v60 = vpop.f32.mrf.mxu1 }
 0x37d   :  { %1527 = vst.msk [vmem:[%s2922_s9 + $0xe0] sm:$0xff] %vm72_vm0, %v1481_v26  ;;  %v1496_v27 = vadd.f32 %v2061_v60, %v2751_v29 }
 0x37e   :  { %v1490_v28 = vpop.f32.mrf.mxu1 }
 0x37f   :  { %1530 = vst.msk [vmem:[%s2922_s9 + $0xf8] sm:$0xff] %vm72_vm0, %v1496_v27  ;;  %v1491_v30 = vadd.f32 %v2751_v29, %v1490_v28 }
 0x381   :  { %1529 = vst.msk [vmem:[%s2922_s9 + $0xf0] sm:$0xff] %vm72_vm0, %v1491_v30 }

// kernel: dnn_forward.1
= control target key start
LH: loop header
LB: loop body
LE: loop exit
PB: predicated region body
PF: predicated region fallthrough
CT: control target
= control target key end

     0   :  { %vm72_vm0 = vcmask 64512   ;;  %vm441_vm1 = vcmask 523264   ;;  %s2913_s1 = inlined_call_operand.vmem [shape: f32[8,64], index: 1, kind: input, shape index: {}]   ;;  %s2914_s0 = inlined_call_operand.vmem [shape: f32[256,8], index: 0, kind: input, shape index: {}]   ;;  %s2915_s3 = inlined_call_operand.vmem [shape: f32[64,64], index: 3, kind: input, shape index: {}]   ;;  %s2916_s5 = inlined_call_operand.vmem [shape: f32[64,64], index: 5, kind: input, shape index: {}]   ;;  %s2917_s2 = inlined_call_operand.vmem [shape: f32[1,64], index: 2, kind: input, shape index: {}]   ;;  %s2918_s7 = inlined_call_operand.vmem [shape: f32[64,8], index: 7, kind: input, shape index: {}]   ;;  %s2919_s4 = inlined_call_operand.vmem [shape: f32[1,64], index: 4, kind: input, shape index: {}]   ;;  %s2920_s6 = inlined_call_operand.vmem [shape: f32[1,64], index: 6, kind: input, shape index: {}]   ;;  %s2921_s8 = inlined_call_operand.vmem [shape: f32[1,8], index: 8, kind: input, shape index: {}]   ;;  %s2922_s9 = inlined_call_operand.vmem [shape: f32[256,8], index: 9, kind: output, shape index: {}]  }
   0x1   :  { %v64_v0 = vld [vmem:[%s2913_s1] sm:$0xff]  ;;  %v33_v2 = vld [vmem:[%s2914_s0 + $0x8] sm:$0xff]  ;;  %v34_v3 = vld [vmem:[%s2914_s0 + $0x10] sm:$0xff] }
   0x2   :  { %v32_v1 = vld [vmem:[%s2914_s0] sm:$0xff]  ;;  %1820 = vmatprep.subr.mxu0 %v64_v0  ;;  %v35_v4 = vld [vmem:[%s2914_s0 + $0x18] sm:$0xff]  ;;  %v37_v6 = vld [vmem:[%s2914_s0 + $0x28] sm:$0xff] }
   0x3   :  { %1822 = vmatprep.mubr.msk.f32.mxu0 %vm72_vm0, %v32_v1  ;;  %1821 = vmatpush3.msra.mxu0 %v64_v0  ;;  %v36_v5 = vld [vmem:[%s2914_s0 + $0x20] sm:$0xff]  ;;  %v38_v7 = vld [vmem:[%s2914_s0 + $0x30] sm:$0xff]  ;;  %v39_v8 = vld [vmem:[%s2914_s0 + $0x38] sm:$0xff] }
   0x4   :  { %1823 = vmatmul.mubr.msk.f32.vlgmr.msra.gmra.mxu0 %vm72_vm0, %v33_v2  ;;  %v40_v9 = vld [vmem:[%s2914_s0 + $0x40] sm:$0xff]  ;;  %v41_v10 = vld [vmem:[%s2914_s0 + $0x48] sm:$0xff]  ;;  %v42_v11 = vld [vmem:[%s2914_s0 + $0x50] sm:$0xff] }
   0x5   :  { %1825 = vmatprep.mubr.msk.f32.mxu0 %vm72_vm0, %v34_v3  ;;  %v43_v12 = vld [vmem:[%s2914_s0 + $0x58] sm:$0xff]  ;;  %v44_v13 = vld [vmem:[%s2914_s0 + $0x60] sm:$0xff]  ;;  %v45_v14 = vld [vmem:[%s2914_s0 + $0x68] sm:$0xff] }
   0x6   :  { %v46_v15 = vld [vmem:[%s2914_s0 + $0x70] sm:$0xff]  ;;  %v47_v16 = vld [vmem:[%s2914_s0 + $0x78] sm:$0xff]  ;;  %v48_v17 = vld [vmem:[%s2914_s0 + $0x80] sm:$0xff] }
   0x7   :  { %v49_v18 = vld [vmem:[%s2914_s0 + $0x88] sm:$0xff]  ;;  %v50_v19 = vld [vmem:[%s2914_s0 + $0x90] sm:$0xff]  ;;  %v51_v20 = vld [vmem:[%s2914_s0 + $0x98] sm:$0xff] }
   0x8   :  { %1826 = vmatmul.mubr.msk.f32.gmra.mxu0 %vm72_vm0, %v35_v4  ;;  %v52_v21 = vld [vmem:[%s2914_s0 + $0xa0] sm:$0xff]  ;;  %v53_v22 = vld [vmem:[%s2914_s0 + $0xa8] sm:$0xff]  ;;  %v54_v23 = vld [vmem:[%s2914_s0 + $0xb0] sm:$0xff] }
   0x9   :  { %1828 = vmatprep.mubr.msk.f32.mxu0 %vm72_vm0, %v36_v5  ;;  %v55_v24 = vld [vmem:[%s2914_s0 + $0xb8] sm:$0xff]  ;;  %v56_v25 = vld [vmem:[%s2914_s0 + $0xc0] sm:$0xff]  ;;  %v57_v26 = vld [vmem:[%s2914_s0 + $0xc8] sm:$0xff] }
   0xa   :  { %v58_v27 = vld [vmem:[%s2914_s0 + $0xd0] sm:$0xff]  ;;  %v59_v28 = vld [vmem:[%s2914_s0 + $0xd8] sm:$0xff]  ;;  %v60_v29 = vld [vmem:[%s2914_s0 + $0xe0] sm:$0xff] }
   0xb   :  { %v61_v30 = vld [vmem:[%s2914_s0 + $0xe8] sm:$0xff]  ;;  %v62_v31 = vld [vmem:[%s2914_s0 + $0xf0] sm:$0xff]  ;;  %v63_v32 = vld [vmem:[%s2914_s0 + $0xf8] sm:$0xff] }
   0xc   :  { %1829 = vmatmul.mubr.msk.f32.gmra.mxu0 %vm72_vm0, %v37_v6  ;;  %v433_v33 = vld [vmem:[%s2915_s3 + $0x38] sm:$0xff]  ;;  %v432_v34 = vld [vmem:[%s2915_s3 + $0x30] sm:$0xff]  ;;  %v431_v35 = vld [vmem:[%s2915_s3 + $0x28] sm:$0xff] }
   0xd   :  { %1831 = vmatprep.mubr.msk.f32.mxu0 %vm72_vm0, %v38_v7  ;;  %1870 = vmatprep.subr.mxu1 %v433_v33  ;;  %v430_v36 = vld [vmem:[%s2915_s3 + $0x20] sm:$0xff]  ;;  %v429_v37 = vld [vmem:[%s2915_s3 + $0x18] sm:$0xff]  ;;  %v428_v38 = vld [vmem:[%s2915_s3 + $0x10] sm:$0xff] }
   0xe   :  { %1871 = vmatpush3.msra.mxu1 %v433_v33  ;;  %v427_v39 = vld [vmem:[%s2915_s3 + $0x8] sm:$0xff]  ;;  %v426_v40 = vld [vmem:[%s2915_s3] sm:$0xff]  ;;  %v802_v41 = vld [vmem:[%s2916_s5 + $0x38] sm:$0xff] }
   0xf   :  { %1872 = vmatprep.subr.mxu1 %v432_v34  ;;  %v801_v42 = vld [vmem:[%s2916_s5 + $0x30] sm:$0xff]  ;;  %1934 = vmatprep.subr.mxu0 %v802_v41  ;;  %v800_v43 = vld [vmem:[%s2916_s5 + $0x28] sm:$0xff]  ;;  %v799_v44 = vld [vmem:[%s2916_s5 + $0x20] sm:$0xff] }
  0x10   :  { %1832 = vmatmul.mubr.msk.f32.gmra.mxu0 %vm72_vm0, %v39_v8  ;;  %1873 = vmatpush3.msra.mxu1 %v432_v34  ;;  %v798_v45 = vld [vmem:[%s2916_s5 + $0x18] sm:$0xff]  ;;  %v797_v46 = vld [vmem:[%s2916_s5 + $0x10] sm:$0xff]  ;;  %v2496_v47 = vld [vmem:[%s2917_s2] ss:$0 sm:$0xff] }
  0x11   :  { %1834 = vmatprep.mubr.msk.f32.mxu0 %vm72_vm0, %v40_v9  ;;  %1874 = vmatprep.subr.mxu1 %v431_v35 }
  0x12   :  { %1875 = vmatpush3.msra.mxu1 %v431_v35  ;;  %1935 = vmatpush3.msra.mxu0 %v802_v41 }
  0x13   :  { %1876 = vmatprep.subr.mxu1 %v430_v36  ;;  %1936 = vmatprep.subr.mxu0 %v801_v42 }
  0x14   :  { %1835 = vmatmul.mubr.msk.f32.gmra.mxu0 %vm72_vm0, %v41_v10  ;;  %1877 = vmatpush3.msra.mxu1 %v430_v36 }
  0x15   :  { %1837 = vmatprep.mubr.msk.f32.mxu0 %vm72_vm0, %v42_v11  ;;  %1878 = vmatprep.subr.mxu1 %v429_v37 }
  0x16   :  { %1879 = vmatpush3.msra.mxu1 %v429_v37  ;;  %1937 = vmatpush3.msra.mxu0 %v801_v42 }
  0x17   :  { %1880 = vmatprep.subr.mxu1 %v428_v38  ;;  %1938 = vmatprep.subr.mxu0 %v800_v43 }
  0x18   :  { %1838 = vmatmul.mubr.msk.f32.gmra.mxu0 %vm72_vm0, %v43_v12  ;;  %1881 = vmatpush3.msra.mxu1 %v428_v38 }
  0x19   :  { %1840 = vmatprep.mubr.msk.f32.mxu0 %vm72_vm0, %v44_v13  ;;  %1882 = vmatprep.subr.mxu1 %v427_v39 }
  0x1a   :  { %1883 = vmatpush3.msra.mxu1 %v427_v39  ;;  %1939 = vmatpush3.msra.mxu0 %v800_v43 }
  0x1b   :  { %1884 = vmatprep.subr.mxu1 %v426_v40  ;;  %1940 = vmatprep.subr.mxu0 %v799_v44 }
  0x1c   :  { %1841 = vmatmul.mubr.msk.f32.gmra.mxu0 %vm72_vm0, %v45_v14  ;;  %1885 = vmatpush3.msra.mxu1 %v426_v40 }
  0x1d   :  { %1843 = vmatprep.mubr.msk.f32.mxu0 %vm72_vm0, %v46_v15  ;;  %1941 = vmatpush3.msra.mxu0 %v799_v44 }
  0x1e   :  { %1942 = vmatprep.subr.mxu0 %v798_v45 }
  0x1f   :  { %1943 = vmatpush3.msra.mxu0 %v798_v45 }
  0x20   :  { %1844 = vmatmul.mubr.msk.f32.gmra.mxu0 %vm72_vm0, %v47_v16  ;;  %1944 = vmatprep.subr.mxu0 %v797_v46 }
  0x21   :  { %1846 = vmatprep.mubr.msk.f32.mxu0 %vm72_vm0, %v48_v17  ;;  %1945 = vmatpush3.msra.mxu0 %v797_v46 }
  0x24   :  { %1847 = vmatmul.mubr.msk.f32.gmra.mxu0 %vm72_vm0, %v49_v18 }
  0x25   :  { %1849 = vmatprep.mubr.msk.f32.mxu0 %vm72_vm0, %v50_v19 }
  0x28   :  { %1850 = vmatmul.mubr.msk.f32.gmra.mxu0 %vm72_vm0, %v51_v20 }
  0x29   :  { %1852 = vmatprep.mubr.msk.f32.mxu0 %vm72_vm0, %v52_v21 }
  0x2c   :  { %1853 = vmatmul.mubr.msk.f32.gmra.mxu0 %vm72_vm0, %v53_v22 }
  0x2d   :  { %1855 = vmatprep.mubr.msk.f32.mxu0 %vm72_vm0, %v54_v23 }
  0x30   :  { %1856 = vmatmul.mubr.msk.f32.gmra.mxu0 %vm72_vm0, %v55_v24 }
  0x31   :  { %1858 = vmatprep.mubr.msk.f32.mxu0 %vm72_vm0, %v56_v25 }
  0x34   :  { %1859 = vmatmul.mubr.msk.f32.gmra.mxu0 %vm72_vm0, %v57_v26 }
  0x35   :  { %1861 = vmatprep.mubr.msk.f32.mxu0 %vm72_vm0, %v58_v27 }
  0x38   :  { %1862 = vmatmul.mubr.msk.f32.gmra.mxu0 %vm72_vm0, %v59_v28 }
  0x39   :  { %1864 = vmatprep.mubr.msk.f32.mxu0 %vm72_vm0, %v60_v29 }
  0x3c   :  { %1865 = vmatmul.mubr.msk.f32.gmra.mxu0 %vm72_vm0, %v61_v30 }
  0x3d   :  { %1867 = vmatprep.mubr.msk.f32.mxu0 %vm72_vm0, %v62_v31 }
  0x40   :  { %1868 = vmatmul.mubr.msk.f32.gmra.mxu0 %vm72_vm0, %v63_v32 }
  0xc4   :  { %v1824_v48 = vpop.f32.mrf.mxu0 }
  0xc5   :  { %v241_v49 = vadd.f32 %v1824_v48, %v2496_v47 }
  0xc6   :  { %v235_v50 = vpop.f32.mrf.mxu0 }
  0xc7   :  { %v236_v51 = vadd.f32 %v2496_v47, %v235_v50 }
  0xc8   :  { %v1827_v52 = vpop.f32.mrf.mxu0 }
  0xc9   :  { %2078 = vtanh.f32 %v236_v51  ;;  %v251_v53 = vadd.f32 %v1827_v52, %v2496_v47 }
  0xca   :  { %2080 = vtanh.f32 %v241_v49  ;;  %v245_v54 = vpop.f32.mrf.mxu0 }
  0xcb   :  { %v246_v55 = vadd.f32 %v2496_v47, %v245_v54 }
  0xcc   :  { %v1830_v56 = vpop.f32.mrf.mxu0 }
  0xcd   :  { %2082 = vtanh.f32 %v246_v55  ;;  %v261_v57 = vadd.f32 %v1830_v56, %v2496_v47 }
  0xce   :  { %2084 = vtanh.f32 %v251_v53  ;;  %v255_v58 = vpop.f32.mrf.mxu0 }
  0xcf   :  { %v256_v59 = vadd.f32 %v2496_v47, %v255_v58 }
  0xd0   :  { %v1833_v60 = vpop.f32.mrf.mxu0 }
  0xd1   :  { %2086 = vtanh.f32 %v256_v59  ;;  %v271_v61 = vadd.f32 %v1833_v60, %v2496_v47 }
  0xd2   :  { %2088 = vtanh.f32 %v261_v57  ;;  %v265_v62 = vpop.f32.mrf.mxu0 }
  0xd3   :  { %v266_v63 = vadd.f32 %v2496_v47, %v265_v62 }
  0xd4   :  { %v1836_v0 = vpop.f32.mrf.mxu0 }
  0xd5   :  { %2090 = vtanh.f32 %v266_v63  ;;  %v281_v2 = vadd.f32 %v1836_v0, %v2496_v47 }
  0xd6   :  { %v2079_v1 = vpop.eup %2078  ;;  %2092 = vtanh.f32 %v271_v61  ;;  %v275_v3 = vpop.f32.mrf.mxu0 }
  0xd7   :  { %v2081_v4 = vpop.eup %2080  ;;  %v276_v5 = vadd.f32 %v2496_v47, %v275_v3  ;;  %1886 = vmatprep.mubr.msk.f32.mxu1 %vm441_vm1, %v2079_v1 }
  0xd8   :  { %v1839_v6 = vpop.f32.mrf.mxu0  ;;  %1887 = vmatmul.mubr.msk.f32.vlgmr.msra.gmra.mxu1 %vm441_vm1, %v2081_v4 }
  0xd9   :  { %2094 = vtanh.f32 %v276_v5  ;;  %v291_v8 = vadd.f32 %v1839_v6, %v2496_v47 }
  0xda   :  { %v2083_v7 = vpop.eup %2082  ;;  %2096 = vtanh.f32 %v281_v2  ;;  %v285_v9 = vpop.f32.mrf.mxu0 }
  0xdb   :  { %v2085_v10 = vpop.eup %2084  ;;  %v286_v11 = vadd.f32 %v2496_v47, %v285_v9  ;;  %1889 = vmatprep.mubr.msk.f32.mxu1 %vm441_vm1, %v2083_v7 }
  0xdc   :  { %v1842_v12 = vpop.f32.mrf.mxu0  ;;  %1890 = vmatmul.mubr.msk.f32.gmra.mxu1 %vm441_vm1, %v2085_v10 }
  0xdd   :  { %2098 = vtanh.f32 %v286_v11  ;;  %v301_v14 = vadd.f32 %v1842_v12, %v2496_v47 }
  0xde   :  { %v2087_v13 = vpop.eup %2086  ;;  %2100 = vtanh.f32 %v291_v8  ;;  %v295_v15 = vpop.f32.mrf.mxu0 }
  0xdf   :  { %v2089_v16 = vpop.eup %2088  ;;  %v296_v17 = vadd.f32 %v2496_v47, %v295_v15  ;;  %1892 = vmatprep.mubr.msk.f32.mxu1 %vm441_vm1, %v2087_v13 }
  0xe0   :  { %v1845_v18 = vpop.f32.mrf.mxu0  ;;  %1893 = vmatmul.mubr.msk.f32.gmra.mxu1 %vm441_vm1, %v2089_v16  ;;  %v796_v16 = vld [vmem:[%s2916_s5 + $0x8] sm:$0xff] }
  0xe1   :  { %2102 = vtanh.f32 %v296_v17  ;;  %v311_v20 = vadd.f32 %v1845_v18, %v2496_v47  ;;  %1946 = vmatprep.subr.mxu0 %v796_v16  ;;  %v795_v17 = vld [vmem:[%s2916_s5] sm:$0xff]  ;;  %v1170_v18 = vld [vmem:[%s2918_s7 + $0x38] sm:$0xff] }
  0xe2   :  { %v2091_v19 = vpop.eup %2090  ;;  %2104 = vtanh.f32 %v301_v14  ;;  %v305_v21 = vpop.f32.mrf.mxu0  ;;  %1947 = vmatpush3.msra.mxu0 %v796_v16  ;;  %2062 = vmatprep.subr.mxu1 %v1170_v18 }
  0xe3   :  { %v2093_v22 = vpop.eup %2092  ;;  %v306_v23 = vadd.f32 %v2496_v47, %v305_v21  ;;  %1895 = vmatprep.mubr.msk.f32.mxu1 %vm441_vm1, %v2091_v19  ;;  %1948 = vmatprep.subr.mxu0 %v795_v17  ;;  %v1169_v19 = vld [vmem:[%s2918_s7 + $0x30] sm:$0xff]  ;;  %v2580_v21 = vld [vmem:[%s2918_s7 + $0x20] sm:$0xff] }
  0xe4   :  { %v1848_v24 = vpop.f32.mrf.mxu0  ;;  %1896 = vmatmul.mubr.msk.f32.gmra.mxu1 %vm441_vm1, %v2093_v22  ;;  %1949 = vmatpush3.msra.mxu0 %v795_v17  ;;  %v2587_v22 = vld [vmem:[%s2918_s7 + $0x18] sm:$0xff] }
  0xe5   :  { %2106 = vtanh.f32 %v306_v23  ;;  %v321_v26 = vadd.f32 %v1848_v24, %v2496_v47  ;;  %1998 = vmatprep.subr.mxu0 %v1170_v18  ;;  %2070 = vmatpush3.msra.mxu1 %v1170_v18  ;;  %v2594_v23 = vld [vmem:[%s2918_s7 + $0x10] sm:$0xff]  ;;  %v2601_v24 = vld [vmem:[%s2919_s4] ss:$0 sm:$0xff] }
  0xe6   :  { %v2095_v25 = vpop.eup %2094  ;;  %2108 = vtanh.f32 %v311_v20  ;;  %v315_v27 = vpop.f32.mrf.mxu0  ;;  %2063 = vmatprep.subr.mxu1 %v1169_v19  ;;  %v1168_v20 = vld [vmem:[%s2918_s7 + $0x28] sm:$0xff] }
  0xe7   :  { %v2097_v28 = vpop.eup %2096  ;;  %v316_v29 = vadd.f32 %v2496_v47, %v315_v27  ;;  %1898 = vmatprep.mubr.msk.f32.mxu1 %vm441_vm1, %v2095_v25  ;;  %2071 = vmatpush3.msra.mxu1 %v1169_v19 }
  0xe8   :  { %v1851_v30 = vpop.f32.mrf.mxu0  ;;  %1899 = vmatmul.mubr.msk.f32.gmra.mxu1 %vm441_vm1, %v2097_v28  ;;  %2064 = vmatprep.subr.mxu1 %v1168_v20 }
  0xe9   :  { %2110 = vtanh.f32 %v316_v29  ;;  %v331_v32 = vadd.f32 %v1851_v30, %v2496_v47  ;;  %2072 = vmatpush3.msra.mxu1 %v1168_v20 }
  0xea   :  { %v2099_v31 = vpop.eup %2098  ;;  %2112 = vtanh.f32 %v321_v26  ;;  %v325_v33 = vpop.f32.mrf.mxu0  ;;  %2065 = vmatprep.subr.mxu1 %v2580_v21 }
  0xeb   :  { %v2101_v34 = vpop.eup %2100  ;;  %v326_v35 = vadd.f32 %v2496_v47, %v325_v33  ;;  %1901 = vmatprep.mubr.msk.f32.mxu1 %vm441_vm1, %v2099_v31  ;;  %2073 = vmatpush3.msra.mxu1 %v2580_v21 }
  0xec   :  { %v1854_v36 = vpop.f32.mrf.mxu0  ;;  %1902 = vmatmul.mubr.msk.f32.gmra.mxu1 %vm441_vm1, %v2101_v34  ;;  %2066 = vmatprep.subr.mxu1 %v2587_v22 }
  0xed   :  { %2114 = vtanh.f32 %v326_v35  ;;  %v341_v38 = vadd.f32 %v1854_v36, %v2496_v47  ;;  %2074 = vmatpush3.msra.mxu1 %v2587_v22 }
  0xee   :  { %v2103_v37 = vpop.eup %2102  ;;  %2116 = vtanh.f32 %v331_v32  ;;  %v335_v39 = vpop.f32.mrf.mxu0  ;;  %2067 = vmatprep.subr.mxu1 %v2594_v23 }
  0xef   :  { %v2105_v40 = vpop.eup %2104  ;;  %v336_v41 = vadd.f32 %v2496_v47, %v335_v39  ;;  %1904 = vmatprep.mubr.msk.f32.mxu1 %vm441_vm1, %v2103_v37  ;;  %2075 = vmatpush3.msra.mxu1 %v2594_v23 }
  0xf0   :  { %v1857_v42 = vpop.f32.mrf.mxu0  ;;  %1905 = vmatmul.mubr.msk.f32.gmra.mxu1 %vm441_vm1, %v2105_v40 }
  0xf1   :  { %2118 = vtanh.f32 %v336_v41  ;;  %v351_v44 = vadd.f32 %v1857_v42, %v2496_v47 }
  0xf2   :  { %v2107_v43 = vpop.eup %2106  ;;  %2120 = vtanh.f32 %v341_v38  ;;  %v345_v45 = vpop.f32.mrf.mxu0 }
  0xf3   :  { %v2109_v46 = vpop.eup %2108  ;;  %v346_v48 = vadd.f32 %v2496_v47, %v345_v45  ;;  %1907 = vmatprep.mubr.msk.f32.mxu1 %vm441_vm1, %v2107_v43 }
  0xf4   :  { %v1860_v49 = vpop.f32.mrf.mxu0  ;;  %1908 = vmatmul.mubr.msk.f32.gmra.mxu1 %vm441_vm1, %v2109_v46 }
  0xf5   :  { %2122 = vtanh.f32 %v346_v48  ;;  %v361_v51 = vadd.f32 %v1860_v49, %v2496_v47 }
  0xf6   :  { %v2111_v50 = vpop.eup %2110  ;;  %2124 = vtanh.f32 %v351_v44  ;;  %v355_v52 = vpop.f32.mrf.mxu0 }
  0xf7   :  { %v2113_v53 = vpop.eup %2112  ;;  %v356_v54 = vadd.f32 %v2496_v47, %v355_v52  ;;  %1910 = vmatprep.mubr.msk.f32.mxu1 %vm441_vm1, %v2111_v50 }
  0xf8   :  { %v1863_v55 = vpop.f32.mrf.mxu0  ;;  %1911 = vmatmul.mubr.msk.f32.gmra.mxu1 %vm441_vm1, %v2113_v53 }
  0xf9   :  { %2126 = vtanh.f32 %v356_v54  ;;  %v371_v57 = vadd.f32 %v1863_v55, %v2496_v47 }
  0xfa   :  { %v2115_v56 = vpop.eup %2114  ;;  %2128 = vtanh.f32 %v361_v51  ;;  %v365_v58 = vpop.f32.mrf.mxu0 }
  0xfb   :  { %v2117_v59 = vpop.eup %2116  ;;  %v366_v60 = vadd.f32 %v2496_v47, %v365_v58  ;;  %1913 = vmatprep.mubr.msk.f32.mxu1 %vm441_vm1, %v2115_v56 }
  0xfc   :  { %v1866_v61 = vpop.f32.mrf.mxu0  ;;  %1914 = vmatmul.mubr.msk.f32.gmra.mxu1 %vm441_vm1, %v2117_v59 }
  0xfd   :  { %2130 = vtanh.f32 %v366_v60  ;;  %v381_v63 = vadd.f32 %v1866_v61, %v2496_v47 }
  0xfe   :  { %v2119_v62 = vpop.eup %2118  ;;  %2132 = vtanh.f32 %v371_v57  ;;  %v375_v0 = vpop.f32.mrf.mxu0 }
  0xff   :  { %v2121_v1 = vpop.eup %2120  ;;  %v376_v2 = vadd.f32 %v2496_v47, %v375_v0  ;;  %1916 = vmatprep.mubr.msk.f32.mxu1 %vm441_vm1, %v2119_v62 }
 0x100   :  { %v1869_v3 = vpop.f32.mrf.mxu0  ;;  %1917 = vmatmul.mubr.msk.f32.gmra.mxu1 %vm441_vm1, %v2121_v1 }
 0x101   :  { %2134 = vtanh.f32 %v376_v2  ;;  %v391_v5 = vadd.f32 %v1869_v3, %v2496_v47 }
 0x102   :  { %v2123_v4 = vpop.eup %2122  ;;  %2136 = vtanh.f32 %v381_v63  ;;  %v385_v6 = vpop.f32.mrf.mxu0 }
 0x103   :  { %v2125_v7 = vpop.eup %2124  ;;  %v386_v8 = vadd.f32 %v2496_v47, %v385_v6  ;;  %1919 = vmatprep.mubr.msk.f32.mxu1 %vm441_vm1, %v2123_v4 }
 0x104   :  { %1920 = vmatmul.mubr.msk.f32.gmra.mxu1 %vm441_vm1, %v2125_v7 }
 0x105   :  { %2138 = vtanh.f32 %v386_v8 }
 0x106   :  { %v2127_v9 = vpop.eup %2126  ;;  %2140 = vtanh.f32 %v391_v5 }
 0x107   :  { %v2129_v10 = vpop.eup %2128  ;;  %1922 = vmatprep.mubr.msk.f32.mxu1 %vm441_vm1, %v2127_v9 }
 0x108   :  { %1923 = vmatmul.mubr.msk.f32.gmra.mxu1 %vm441_vm1, %v2129_v10 }
 0x10a   :  { %v2131_v11 = vpop.eup %2130 }
 0x10b   :  { %v2133_v12 = vpop.eup %2132  ;;  %1925 = vmatprep.mubr.msk.f32.mxu1 %vm441_vm1, %v2131_v11 }
 0x10c   :  { %1926 = vmatmul.mubr.msk.f32.gmra.mxu1 %vm441_vm1, %v2133_v12 }
 0x10e   :  { %v2135_v13 = vpop.eup %2134 }
 0x10f   :  { %v2137_v47 = vpop.eup %2136  ;;  %1928 = vmatprep.mubr.msk.f32.mxu1 %vm441_vm1, %v2135_v13 }
 0x110   :  { %1929 = vmatmul.mubr.msk.f32.gmra.mxu1 %vm441_vm1, %v2137_v47 }
 0x112   :  { %v2139_v14 = vpop.eup %2138 }
 0x113   :  { %v2141_v15 = vpop.eup %2140  ;;  %1931 = vmatprep.mubr.msk.f32.mxu1 %vm441_vm1, %v2139_v14 }
 0x114   :  { %1932 = vmatmul.mubr.msk.f32.gmra.mxu1 %vm441_vm1, %v2141_v15 }
 0x198   :  { %v1888_v25 = vpop.f32.mrf.mxu1 }
 0x199   :  { %v610_v26 = vadd.f32 %v1888_v25, %v2601_v24 }
 0x19a   :  { %v604_v27 = vpop.f32.mrf.mxu1 }
 0x19b   :  { %v605_v28 = vadd.f32 %v2601_v24, %v604_v27 }
 0x19c   :  { %v1891_v29 = vpop.f32.mrf.mxu1 }
 0x19d   :  { %2142 = vtanh.f32 %v605_v28  ;;  %v620_v30 = vadd.f32 %v1891_v29, %v2601_v24 }
 0x19e   :  { %2144 = vtanh.f32 %v610_v26  ;;  %v614_v31 = vpop.f32.mrf.mxu1 }
 0x19f   :  { %v615_v32 = vadd.f32 %v2601_v24, %v614_v31 }
 0x1a0   :  { %v1894_v33 = vpop.f32.mrf.mxu1 }
 0x1a1   :  { %2146 = vtanh.f32 %v615_v32  ;;  %v630_v34 = vadd.f32 %v1894_v33, %v2601_v24 }
 0x1a2   :  { %2148 = vtanh.f32 %v620_v30  ;;  %v624_v35 = vpop.f32.mrf.mxu1 }
 0x1a3   :  { %v625_v36 = vadd.f32 %v2601_v24, %v624_v35 }
 0x1a4   :  { %v1897_v37 = vpop.f32.mrf.mxu1 }
 0x1a5   :  { %2150 = vtanh.f32 %v625_v36  ;;  %v640_v38 = vadd.f32 %v1897_v37, %v2601_v24 }
 0x1a6   :  { %2152 = vtanh.f32 %v630_v34  ;;  %v634_v39 = vpop.f32.mrf.mxu1 }
 0x1a7   :  { %v635_v40 = vadd.f32 %v2601_v24, %v634_v39 }
 0x1a8   :  { %v1900_v41 = vpop.f32.mrf.mxu1 }
 0x1a9   :  { %2154 = vtanh.f32 %v635_v40  ;;  %v650_v43 = vadd.f32 %v1900_v41, %v2601_v24 }
 0x1aa   :  { %v2143_v42 = vpop.eup %2142  ;;  %2156 = vtanh.f32 %v640_v38  ;;  %v644_v44 = vpop.f32.mrf.mxu1 }
 0x1ab   :  { %v2145_v45 = vpop.eup %2144  ;;  %v645_v46 = vadd.f32 %v2601_v24, %v644_v44  ;;  %1950 = vmatprep.mubr.msk.f32.mxu0 %vm441_vm1, %v2143_v42 }
 0x1ac   :  { %v1903_v48 = vpop.f32.mrf.mxu1  ;;  %1951 = vmatmul.mubr.msk.f32.vlgmr.msra.gmra.mxu0 %vm441_vm1, %v2145_v45 }
 0x1ad   :  { %2158 = vtanh.f32 %v645_v46  ;;  %1999 = vmatpush3.msra.mxu0 %v1170_v18  ;;  %v660_v50 = vadd.f32 %v1903_v48, %v2601_v24 }
 0x1ae   :  { %v2147_v49 = vpop.eup %2146  ;;  %2160 = vtanh.f32 %v650_v43  ;;  %v654_v51 = vpop.f32.mrf.mxu1  ;;  %2000 = vmatprep.subr.mxu0 %v1169_v19 }
 0x1af   :  { %v2149_v52 = vpop.eup %2148  ;;  %v655_v53 = vadd.f32 %v2601_v24, %v654_v51  ;;  %1953 = vmatprep.mubr.msk.f32.mxu0 %vm441_vm1, %v2147_v49  ;;  %2001 = vmatpush3.msra.mxu0 %v1169_v19 }
 0x1b0   :  { %v1906_v54 = vpop.f32.mrf.mxu1  ;;  %1954 = vmatmul.mubr.msk.f32.gmra.mxu0 %vm441_vm1, %v2149_v52  ;;  %2002 = vmatprep.subr.mxu0 %v1168_v20 }
 0x1b1   :  { %2162 = vtanh.f32 %v655_v53  ;;  %2003 = vmatpush3.msra.mxu0 %v1168_v20  ;;  %v670_v56 = vadd.f32 %v1906_v54, %v2601_v24 }
 0x1b2   :  { %v2151_v55 = vpop.eup %2150  ;;  %2164 = vtanh.f32 %v660_v50  ;;  %v664_v57 = vpop.f32.mrf.mxu1  ;;  %2004 = vmatprep.subr.mxu0 %v2580_v21 }
 0x1b3   :  { %v2153_v58 = vpop.eup %2152  ;;  %v665_v59 = vadd.f32 %v2601_v24, %v664_v57  ;;  %1956 = vmatprep.mubr.msk.f32.mxu0 %vm441_vm1, %v2151_v55  ;;  %2005 = vmatpush3.msra.mxu0 %v2580_v21 }
 0x1b4   :  { %v1909_v60 = vpop.f32.mrf.mxu1  ;;  %1957 = vmatmul.mubr.msk.f32.gmra.mxu0 %vm441_vm1, %v2153_v58  ;;  %2006 = vmatprep.subr.mxu0 %v2587_v22  ;;  %v1164_v58 = vld [vmem:[%s2918_s7 + $0x8] sm:$0xff] }
 0x1b5   :  { %2166 = vtanh.f32 %v665_v59  ;;  %2007 = vmatpush3.msra.mxu0 %v2587_v22  ;;  %v680_v62 = vadd.f32 %v1909_v60, %v2601_v24  ;;  %2068 = vmatprep.subr.mxu1 %v1164_v58  ;;  %v1163_v59 = vld [vmem:[%s2918_s7] sm:$0xff] }
 0x1b6   :  { %v2155_v61 = vpop.eup %2154  ;;  %2168 = vtanh.f32 %v670_v56  ;;  %v674_v63 = vpop.f32.mrf.mxu1  ;;  %2008 = vmatprep.subr.mxu0 %v2594_v23  ;;  %2076 = vmatpush3.msra.mxu1 %v1164_v58  ;;  %v2682_v60 = vld [vmem:[%s2920_s6] ss:$0 sm:$0xff] }
 0x1b7   :  { %v2157_v0 = vpop.eup %2156  ;;  %v675_v1 = vadd.f32 %v2601_v24, %v674_v63  ;;  %1959 = vmatprep.mubr.msk.f32.mxu0 %vm441_vm1, %v2155_v61  ;;  %2009 = vmatpush3.msra.mxu0 %v2594_v23 }
 0x1b8   :  { %v1912_v2 = vpop.f32.mrf.mxu1  ;;  %1960 = vmatmul.mubr.msk.f32.gmra.mxu0 %vm441_vm1, %v2157_v0  ;;  %2010 = vmatprep.subr.mxu0 %v1164_v58 }
 0x1b9   :  { %2170 = vtanh.f32 %v675_v1  ;;  %v690_v4 = vadd.f32 %v1912_v2, %v2601_v24  ;;  %2011 = vmatpush3.msra.mxu0 %v1164_v58  ;;  %2069 = vmatprep.subr.mxu1 %v1163_v59 }
 0x1ba   :  { %v2159_v3 = vpop.eup %2158  ;;  %2172 = vtanh.f32 %v680_v62  ;;  %v684_v5 = vpop.f32.mrf.mxu1  ;;  %2012 = vmatprep.subr.mxu0 %v1163_v59  ;;  %2077 = vmatpush3.msra.mxu1 %v1163_v59 }
 0x1bb   :  { %v2161_v6 = vpop.eup %2160  ;;  %v685_v7 = vadd.f32 %v2601_v24, %v684_v5  ;;  %1962 = vmatprep.mubr.msk.f32.mxu0 %vm441_vm1, %v2159_v3  ;;  %2013 = vmatpush3.msra.mxu0 %v1163_v59 }
 0x1bc   :  { %v1915_v8 = vpop.f32.mrf.mxu1  ;;  %1963 = vmatmul.mubr.msk.f32.gmra.mxu0 %vm441_vm1, %v2161_v6 }
 0x1bd   :  { %2174 = vtanh.f32 %v685_v7  ;;  %v700_v10 = vadd.f32 %v1915_v8, %v2601_v24 }
 0x1be   :  { %v2163_v9 = vpop.eup %2162  ;;  %2176 = vtanh.f32 %v690_v4  ;;  %v694_v11 = vpop.f32.mrf.mxu1 }
 0x1bf   :  { %v2165_v12 = vpop.eup %2164  ;;  %v695_v13 = vadd.f32 %v2601_v24, %v694_v11  ;;  %1965 = vmatprep.mubr.msk.f32.mxu0 %vm441_vm1, %v2163_v9 }
 0x1c0   :  { %v1918_v47 = vpop.f32.mrf.mxu1  ;;  %1966 = vmatmul.mubr.msk.f32.gmra.mxu0 %vm441_vm1, %v2165_v12 }
 0x1c1   :  { %2178 = vtanh.f32 %v695_v13  ;;  %v710_v15 = vadd.f32 %v1918_v47, %v2601_v24 }
 0x1c2   :  { %v2167_v14 = vpop.eup %2166  ;;  %2180 = vtanh.f32 %v700_v10  ;;  %v704_v16 = vpop.f32.mrf.mxu1 }
 0x1c3   :  { %v2169_v17 = vpop.eup %2168  ;;  %v705_v18 = vadd.f32 %v2601_v24, %v704_v16  ;;  %1968 = vmatprep.mubr.msk.f32.mxu0 %vm441_vm1, %v2167_v14 }
 0x1c4   :  { %v1921_v19 = vpop.f32.mrf.mxu1  ;;  %1969 = vmatmul.mubr.msk.f32.gmra.mxu0 %vm441_vm1, %v2169_v17 }
 0x1c5   :  { %2182 = vtanh.f32 %v705_v18  ;;  %v720_v21 = vadd.f32 %v1921_v19, %v2601_v24 }
 0x1c6   :  { %v2171_v20 = vpop.eup %2170  ;;  %2184 = vtanh.f32 %v710_v15  ;;  %v714_v22 = vpop.f32.mrf.mxu1 }
 0x1c7   :  { %v2173_v23 = vpop.eup %2172  ;;  %v715_v25 = vadd.f32 %v2601_v24, %v714_v22  ;;  %1971 = vmatprep.mubr.msk.f32.mxu0 %vm441_vm1, %v2171_v20 }
 0x1c8   :  { %v1924_v26 = vpop.f32.mrf.mxu1  ;;  %1972 = vmatmul.mubr.msk.f32.gmra.mxu0 %vm441_vm1, %v2173_v23 }
 0x1c9   :  { %2186 = vtanh.f32 %v715_v25  ;;  %v730_v28 = vadd.f32 %v1924_v26, %v2601_v24 }
 0x1ca   :  { %v2175_v27 = vpop.eup %2174  ;;  %2188 = vtanh.f32 %v720_v21  ;;  %v724_v29 = vpop.f32.mrf.mxu1 }
 0x1cb   :  { %v2177_v30 = vpop.eup %2176  ;;  %v725_v31 = vadd.f32 %v2601_v24, %v724_v29  ;;  %1974 = vmatprep.mubr.msk.f32.mxu0 %vm441_vm1, %v2175_v27 }
 0x1cc   :  { %v1927_v32 = vpop.f32.mrf.mxu1  ;;  %1975 = vmatmul.mubr.msk.f32.gmra.mxu0 %vm441_vm1, %v2177_v30 }
 0x1cd   :  { %2190 = vtanh.f32 %v725_v31  ;;  %v740_v34 = vadd.f32 %v1927_v32, %v2601_v24 }
 0x1ce   :  { %v2179_v33 = vpop.eup %2178  ;;  %2192 = vtanh.f32 %v730_v28  ;;  %v734_v35 = vpop.f32.mrf.mxu1 }
 0x1cf   :  { %v2181_v36 = vpop.eup %2180  ;;  %v735_v37 = vadd.f32 %v2601_v24, %v734_v35  ;;  %1977 = vmatprep.mubr.msk.f32.mxu0 %vm441_vm1, %v2179_v33 }
 0x1d0   :  { %v1930_v38 = vpop.f32.mrf.mxu1  ;;  %1978 = vmatmul.mubr.msk.f32.gmra.mxu0 %vm441_vm1, %v2181_v36 }
 0x1d1   :  { %2194 = vtanh.f32 %v735_v37  ;;  %v750_v40 = vadd.f32 %v1930_v38, %v2601_v24 }
 0x1d2   :  { %v2183_v39 = vpop.eup %2182  ;;  %2196 = vtanh.f32 %v740_v34  ;;  %v744_v41 = vpop.f32.mrf.mxu1 }
 0x1d3   :  { %v2185_v42 = vpop.eup %2184  ;;  %v745_v43 = vadd.f32 %v2601_v24, %v744_v41  ;;  %1980 = vmatprep.mubr.msk.f32.mxu0 %vm441_vm1, %v2183_v39 }
 0x1d4   :  { %v1933_v44 = vpop.f32.mrf.mxu1  ;;  %1981 = vmatmul.mubr.msk.f32.gmra.mxu0 %vm441_vm1, %v2185_v42 }
 0x1d5   :  { %2198 = vtanh.f32 %v745_v43  ;;  %v760_v46 = vadd.f32 %v1933_v44, %v2601_v24 }
 0x1d6   :  { %v2187_v45 = vpop.eup %2186  ;;  %2200 = vtanh.f32 %v750_v40  ;;  %v754_v48 = vpop.f32.mrf.mxu1 }
 0x1d7   :  { %v2189_v49 = vpop.eup %2188  ;;  %v755_v50 = vadd.f32 %v2601_v24, %v754_v48  ;;  %1983 = vmatprep.mubr.msk.f32.mxu0 %vm441_vm1, %v2187_v45 }
 0x1d8   :  { %1984 = vmatmul.mubr.msk.f32.gmra.mxu0 %vm441_vm1, %v2189_v49 }
 0x1d9   :  { %2202 = vtanh.f32 %v755_v50 }
 0x1da   :  { %v2191_v51 = vpop.eup %2190  ;;  %2204 = vtanh.f32 %v760_v46 }
 0x1db   :  { %v2193_v52 = vpop.eup %2192  ;;  %1986 = vmatprep.mubr.msk.f32.mxu0 %vm441_vm1, %v2191_v51 }
 0x1dc   :  { %1987 = vmatmul.mubr.msk.f32.gmra.mxu0 %vm441_vm1, %v2193_v52 }
 0x1de   :  { %v2195_v53 = vpop.eup %2194 }
 0x1df   :  { %v2197_v54 = vpop.eup %2196  ;;  %1989 = vmatprep.mubr.msk.f32.mxu0 %vm441_vm1, %v2195_v53 }
 0x1e0   :  { %1990 = vmatmul.mubr.msk.f32.gmra.mxu0 %vm441_vm1, %v2197_v54 }
 0x1e2   :  { %v2199_v55 = vpop.eup %2198 }
 0x1e3   :  { %v2201_v24 = vpop.eup %2200  ;;  %1992 = vmatprep.mubr.msk.f32.mxu0 %vm441_vm1, %v2199_v55 }
 0x1e4   :  { %1993 = vmatmul.mubr.msk.f32.gmra.mxu0 %vm441_vm1, %v2201_v24 }
 0x1e6   :  { %v2203_v56 = vpop.eup %2202 }
 0x1e7   :  { %v2205_v57 = vpop.eup %2204  ;;  %1995 = vmatprep.mubr.msk.f32.mxu0 %vm441_vm1, %v2203_v56 }
 0x1e8   :  { %1996 = vmatmul.mubr.msk.f32.gmra.mxu0 %vm441_vm1, %v2205_v57 }
 0x26c   :  { %v1952_v61 = vpop.f32.mrf.mxu0 }
 0x26d   :  { %v978_v62 = vadd.f32 %v1952_v61, %v2682_v60 }
 0x26e   :  { %v972_v63 = vpop.f32.mrf.mxu0 }
 0x26f   :  { %v973_v0 = vadd.f32 %v2682_v60, %v972_v63 }
 0x270   :  { %v1955_v1 = vpop.f32.mrf.mxu0 }
 0x271   :  { %2206 = vtanh.f32 %v973_v0  ;;  %v988_v2 = vadd.f32 %v1955_v1, %v2682_v60 }
 0x272   :  { %2208 = vtanh.f32 %v978_v62  ;;  %v982_v3 = vpop.f32.mrf.mxu0 }
 0x273   :  { %v983_v4 = vadd.f32 %v2682_v60, %v982_v3 }
 0x274   :  { %v1958_v5 = vpop.f32.mrf.mxu0 }
 0x275   :  { %2210 = vtanh.f32 %v983_v4  ;;  %v998_v6 = vadd.f32 %v1958_v5, %v2682_v60 }
 0x276   :  { %2212 = vtanh.f32 %v988_v2  ;;  %v992_v7 = vpop.f32.mrf.mxu0 }
 0x277   :  { %v993_v8 = vadd.f32 %v2682_v60, %v992_v7 }
 0x278   :  { %v1961_v9 = vpop.f32.mrf.mxu0 }
 0x279   :  { %2214 = vtanh.f32 %v993_v8  ;;  %v1008_v10 = vadd.f32 %v1961_v9, %v2682_v60 }
 0x27a   :  { %2216 = vtanh.f32 %v998_v6  ;;  %v1002_v11 = vpop.f32.mrf.mxu0 }
 0x27b   :  { %v1003_v12 = vadd.f32 %v2682_v60, %v1002_v11 }
 0x27c   :  { %v1964_v13 = vpop.f32.mrf.mxu0 }
 0x27d   :  { %2218 = vtanh.f32 %v1003_v12  ;;  %v1018_v14 = vadd.f32 %v1964_v13, %v2682_v60 }
 0x27e   :  { %v2207_v47 = vpop.eup %2206  ;;  %2220 = vtanh.f32 %v1008_v10  ;;  %v1012_v15 = vpop.f32.mrf.mxu0 }
 0x27f   :  { %v2209_v16 = vpop.eup %2208  ;;  %v1013_v17 = vadd.f32 %v2682_v60, %v1012_v15  ;;  %2014 = vmatprep.mubr.msk.f32.mxu0 %vm441_vm1, %v2207_v47 }
 0x280   :  { %v1967_v18 = vpop.f32.mrf.mxu0  ;;  %2015 = vmatmul.mubr.msk.f32.vlgmr.msra.gmra.mxu0 %vm441_vm1, %v2209_v16 }
 0x281   :  { %2222 = vtanh.f32 %v1013_v17  ;;  %v1028_v20 = vadd.f32 %v1967_v18, %v2682_v60 }
 0x282   :  { %v2211_v19 = vpop.eup %2210  ;;  %2224 = vtanh.f32 %v1018_v14  ;;  %v1022_v21 = vpop.f32.mrf.mxu0 }
 0x283   :  { %v2213_v22 = vpop.eup %2212  ;;  %v1023_v23 = vadd.f32 %v2682_v60, %v1022_v21  ;;  %2017 = vmatprep.mubr.msk.f32.mxu1 %vm441_vm1, %v2211_v19 }
 0x284   :  { %v1970_v25 = vpop.f32.mrf.mxu0  ;;  %2018 = vmatmul.mubr.msk.f32.vlgmr.msra.gmra.mxu1 %vm441_vm1, %v2213_v22 }
 0x285   :  { %2226 = vtanh.f32 %v1023_v23  ;;  %v1038_v27 = vadd.f32 %v1970_v25, %v2682_v60 }
 0x286   :  { %v2215_v26 = vpop.eup %2214  ;;  %2228 = vtanh.f32 %v1028_v20  ;;  %v1032_v28 = vpop.f32.mrf.mxu0 }
 0x287   :  { %v2217_v29 = vpop.eup %2216  ;;  %v1033_v30 = vadd.f32 %v2682_v60, %v1032_v28  ;;  %2020 = vmatprep.mubr.msk.f32.mxu1 %vm441_vm1, %v2215_v26 }
 0x288   :  { %v1973_v31 = vpop.f32.mrf.mxu0  ;;  %2021 = vmatmul.mubr.msk.f32.gmra.mxu1 %vm441_vm1, %v2217_v29  ;;  %v2751_v29 = vld [vmem:[%s2921_s8] ss:$0 sm:$0xff] }
 0x289   :  { %2230 = vtanh.f32 %v1033_v30  ;;  %v1048_v33 = vadd.f32 %v1973_v31, %v2682_v60 }
 0x28a   :  { %v2219_v32 = vpop.eup %2218  ;;  %2232 = vtanh.f32 %v1038_v27  ;;  %v1042_v34 = vpop.f32.mrf.mxu0 }
 0x28b   :  { %v2221_v35 = vpop.eup %2220  ;;  %v1043_v36 = vadd.f32 %v2682_v60, %v1042_v34  ;;  %2023 = vmatprep.mubr.msk.f32.mxu1 %vm441_vm1, %v2219_v32 }
 0x28c   :  { %v1976_v37 = vpop.f32.mrf.mxu0  ;;  %2024 = vmatmul.mubr.msk.f32.gmra.mxu1 %vm441_vm1, %v2221_v35 }
 0x28d   :  { %2234 = vtanh.f32 %v1043_v36  ;;  %v1058_v39 = vadd.f32 %v1976_v37, %v2682_v60 }
 0x28e   :  { %v2223_v38 = vpop.eup %2222  ;;  %2236 = vtanh.f32 %v1048_v33  ;;  %v1052_v40 = vpop.f32.mrf.mxu0 }
 0x28f   :  { %v2225_v41 = vpop.eup %2224  ;;  %v1053_v42 = vadd.f32 %v2682_v60, %v1052_v40  ;;  %2026 = vmatprep.mubr.msk.f32.mxu1 %vm441_vm1, %v2223_v38 }
 0x290   :  { %v1979_v43 = vpop.f32.mrf.mxu0  ;;  %2027 = vmatmul.mubr.msk.f32.gmra.mxu1 %vm441_vm1, %v2225_v41 }
 0x291   :  { %2238 = vtanh.f32 %v1053_v42  ;;  %v1068_v45 = vadd.f32 %v1979_v43, %v2682_v60 }
 0x292   :  { %v2227_v44 = vpop.eup %2226  ;;  %2240 = vtanh.f32 %v1058_v39  ;;  %v1062_v46 = vpop.f32.mrf.mxu0 }
 0x293   :  { %v2229_v48 = vpop.eup %2228  ;;  %v1063_v49 = vadd.f32 %v2682_v60, %v1062_v46  ;;  %2029 = vmatprep.mubr.msk.f32.mxu1 %vm441_vm1, %v2227_v44 }
 0x294   :  { %v1982_v50 = vpop.f32.mrf.mxu0  ;;  %2030 = vmatmul.mubr.msk.f32.gmra.mxu1 %vm441_vm1, %v2229_v48 }
 0x295   :  { %2242 = vtanh.f32 %v1063_v49  ;;  %v1078_v52 = vadd.f32 %v1982_v50, %v2682_v60 }
 0x296   :  { %v2231_v51 = vpop.eup %2230  ;;  %2244 = vtanh.f32 %v1068_v45  ;;  %v1072_v53 = vpop.f32.mrf.mxu0 }
 0x297   :  { %v2233_v54 = vpop.eup %2232  ;;  %v1073_v55 = vadd.f32 %v2682_v60, %v1072_v53  ;;  %2032 = vmatprep.mubr.msk.f32.mxu1 %vm441_vm1, %v2231_v51 }
 0x298   :  { %v1985_v24 = vpop.f32.mrf.mxu0  ;;  %2033 = vmatmul.mubr.msk.f32.gmra.mxu1 %vm441_vm1, %v2233_v54 }
 0x299   :  { %2246 = vtanh.f32 %v1073_v55  ;;  %v1088_v57 = vadd.f32 %v1985_v24, %v2682_v60 }
 0x29a   :  { %v2235_v56 = vpop.eup %2234  ;;  %2248 = vtanh.f32 %v1078_v52  ;;  %v1082_v58 = vpop.f32.mrf.mxu0 }
 0x29b   :  { %v2237_v59 = vpop.eup %2236  ;;  %v1083_v61 = vadd.f32 %v2682_v60, %v1082_v58  ;;  %2035 = vmatprep.mubr.msk.f32.mxu1 %vm441_vm1, %v2235_v56 }
 0x29c   :  { %v1988_v62 = vpop.f32.mrf.mxu0  ;;  %2036 = vmatmul.mubr.msk.f32.gmra.mxu1 %vm441_vm1, %v2237_v59 }
 0x29d   :  { %2250 = vtanh.f32 %v1083_v61  ;;  %v1098_v0 = vadd.f32 %v1988_v62, %v2682_v60 }
 0x29e   :  { %v2239_v63 = vpop.eup %2238  ;;  %2252 = vtanh.f32 %v1088_v57  ;;  %v1092_v1 = vpop.f32.mrf.mxu0 }
 0x29f   :  { %v2241_v2 = vpop.eup %2240  ;;  %v1093_v3 = vadd.f32 %v2682_v60, %v1092_v1  ;;  %2038 = vmatprep.mubr.msk.f32.mxu1 %vm441_vm1, %v2239_v63 }
 0x2a0   :  { %v1991_v4 = vpop.f32.mrf.mxu0  ;;  %2039 = vmatmul.mubr.msk.f32.gmra.mxu1 %vm441_vm1, %v2241_v2 }
 0x2a1   :  { %2254 = vtanh.f32 %v1093_v3  ;;  %v1108_v6 = vadd.f32 %v1991_v4, %v2682_v60 }
 0x2a2   :  { %v2243_v5 = vpop.eup %2242  ;;  %2256 = vtanh.f32 %v1098_v0  ;;  %v1102_v7 = vpop.f32.mrf.mxu0 }
 0x2a3   :  { %v2245_v8 = vpop.eup %2244  ;;  %v1103_v9 = vadd.f32 %v2682_v60, %v1102_v7  ;;  %2041 = vmatprep.mubr.msk.f32.mxu1 %vm441_vm1, %v2243_v5 }
 0x2a4   :  { %v1994_v10 = vpop.f32.mrf.mxu0  ;;  %2042 = vmatmul.mubr.msk.f32.gmra.mxu1 %vm441_vm1, %v2245_v8 }
 0x2a5   :  { %2258 = vtanh.f32 %v1103_v9  ;;  %v1118_v12 = vadd.f32 %v1994_v10, %v2682_v60 }
 0x2a6   :  { %v2247_v11 = vpop.eup %2246  ;;  %2260 = vtanh.f32 %v1108_v6  ;;  %v1112_v13 = vpop.f32.mrf.mxu0 }
 0x2a7   :  { %v2249_v47 = vpop.eup %2248  ;;  %v1113_v14 = vadd.f32 %v2682_v60, %v1112_v13  ;;  %2044 = vmatprep.mubr.msk.f32.mxu1 %vm441_vm1, %v2247_v11 }
 0x2a8   :  { %v1997_v15 = vpop.f32.mrf.mxu0  ;;  %2045 = vmatmul.mubr.msk.f32.gmra.mxu1 %vm441_vm1, %v2249_v47 }
 0x2a9   :  { %2262 = vtanh.f32 %v1113_v14  ;;  %v1128_v17 = vadd.f32 %v1997_v15, %v2682_v60 }
 0x2aa   :  { %v2251_v16 = vpop.eup %2250  ;;  %2264 = vtanh.f32 %v1118_v12  ;;  %v1122_v18 = vpop.f32.mrf.mxu0 }
 0x2ab   :  { %v2253_v19 = vpop.eup %2252  ;;  %v1123_v20 = vadd.f32 %v2682_v60, %v1122_v18  ;;  %2047 = vmatprep.mubr.msk.f32.mxu1 %vm441_vm1, %v2251_v16 }
 0x2ac   :  { %2048 = vmatmul.mubr.msk.f32.gmra.mxu1 %vm441_vm1, %v2253_v19 }
 0x2ad   :  { %2266 = vtanh.f32 %v1123_v20 }
 0x2ae   :  { %v2255_v21 = vpop.eup %2254  ;;  %2268 = vtanh.f32 %v1128_v17 }
 0x2af   :  { %v2257_v22 = vpop.eup %2256  ;;  %2050 = vmatprep.mubr.msk.f32.mxu1 %vm441_vm1, %v2255_v21 }
 0x2b0   :  { %2051 = vmatmul.mubr.msk.f32.gmra.mxu1 %vm441_vm1, %v2257_v22 }
 0x2b2   :  { %v2259_v23 = vpop.eup %2258 }
 0x2b3   :  { %v2261_v25 = vpop.eup %2260  ;;  %2053 = vmatprep.mubr.msk.f32.mxu1 %vm441_vm1, %v2259_v23 }
 0x2b4   :  { %2054 = vmatmul.mubr.msk.f32.gmra.mxu1 %vm441_vm1, %v2261_v25 }
 0x2b6   :  { %v2263_v26 = vpop.eup %2262 }
 0x2b7   :  { %v2265_v60 = vpop.eup %2264  ;;  %2056 = vmatprep.mubr.msk.f32.mxu1 %vm441_vm1, %v2263_v26 }
 0x2b8   :  { %2057 = vmatmul.mubr.msk.f32.gmra.mxu1 %vm441_vm1, %v2265_v60 }
 0x2ba   :  { %v2267_v27 = vpop.eup %2266 }
 0x2bb   :  { %v2269_v28 = vpop.eup %2268  ;;  %2059 = vmatprep.mubr.msk.f32.mxu1 %vm441_vm1, %v2267_v27 }
 0x2bc   :  { %2060 = vmatmul.mubr.msk.f32.gmra.mxu1 %vm441_vm1, %v2269_v28 }
 0x340   :  { %v2016_v30 = vpop.f32.mrf.mxu0 }
 0x341   :  { %v1346_v31 = vadd.f32 %v2016_v30, %v2751_v29 }
 0x342   :  { %v1340_v32 = vpop.f32.mrf.mxu0 }
 0x343   :  { %1500 = vst.msk [vmem:[%s2922_s9 + $0x8] sm:$0xff] %vm72_vm0, %v1346_v31  ;;  %v1341_v33 = vadd.f32 %v2751_v29, %v1340_v32 }
 0x344   :  { %v2019_v34 = vpop.f32.mrf.mxu1 }
 0x345   :  { %1499 = vst.msk [vmem:[%s2922_s9] sm:$0xff] %vm72_vm0, %v1341_v33  ;;  %v1356_v35 = vadd.f32 %v2019_v34, %v2751_v29 }
 0x346   :  { %v1350_v36 = vpop.f32.mrf.mxu1 }
 0x347   :  { %1502 = vst.msk [vmem:[%s2922_s9 + $0x18] sm:$0xff] %vm72_vm0, %v1356_v35  ;;  %v1351_v37 = vadd.f32 %v2751_v29, %v1350_v36 }
 0x348   :  { %v2022_v38 = vpop.f32.mrf.mxu1 }
 0x349   :  { %1501 = vst.msk [vmem:[%s2922_s9 + $0x10] sm:$0xff] %vm72_vm0, %v1351_v37  ;;  %v1366_v39 = vadd.f32 %v2022_v38, %v2751_v29 }
 0x34a   :  { %v1360_v40 = vpop.f32.mrf.mxu1 }
 0x34b   :  { %1504 = vst.msk [vmem:[%s2922_s9 + $0x28] sm:$0xff] %vm72_vm0, %v1366_v39  ;;  %v1361_v41 = vadd.f32 %v2751_v29, %v1360_v40 }
 0x34c   :  { %v2025_v42 = vpop.f32.mrf.mxu1 }
 0x34d   :  { %1503 = vst.msk [vmem:[%s2922_s9 + $0x20] sm:$0xff] %vm72_vm0, %v1361_v41  ;;  %v1376_v43 = vadd.f32 %v2025_v42, %v2751_v29 }
 0x34e   :  { %v1370_v44 = vpop.f32.mrf.mxu1 }
 0x34f   :  { %1506 = vst.msk [vmem:[%s2922_s9 + $0x38] sm:$0xff] %vm72_vm0, %v1376_v43  ;;  %v1371_v45 = vadd.f32 %v2751_v29, %v1370_v44 }
 0x350   :  { %v2028_v46 = vpop.f32.mrf.mxu1 }
 0x351   :  { %1505 = vst.msk [vmem:[%s2922_s9 + $0x30] sm:$0xff] %vm72_vm0, %v1371_v45  ;;  %v1386_v48 = vadd.f32 %v2028_v46, %v2751_v29 }
 0x352   :  { %v1380_v49 = vpop.f32.mrf.mxu1 }
 0x353   :  { %1508 = vst.msk [vmem:[%s2922_s9 + $0x48] sm:$0xff] %vm72_vm0, %v1386_v48  ;;  %v1381_v50 = vadd.f32 %v2751_v29, %v1380_v49 }
 0x354   :  { %v2031_v51 = vpop.f32.mrf.mxu1 }
 0x355   :  { %1507 = vst.msk [vmem:[%s2922_s9 + $0x40] sm:$0xff] %vm72_vm0, %v1381_v50  ;;  %v1396_v52 = vadd.f32 %v2031_v51, %v2751_v29 }
 0x356   :  { %v1390_v53 = vpop.f32.mrf.mxu1 }
 0x357   :  { %1510 = vst.msk [vmem:[%s2922_s9 + $0x58] sm:$0xff] %vm72_vm0, %v1396_v52  ;;  %v1391_v54 = vadd.f32 %v2751_v29, %v1390_v53 }
 0x358   :  { %v2034_v55 = vpop.f32.mrf.mxu1 }
 0x359   :  { %1509 = vst.msk [vmem:[%s2922_s9 + $0x50] sm:$0xff] %vm72_vm0, %v1391_v54  ;;  %v1406_v24 = vadd.f32 %v2034_v55, %v2751_v29 }
 0x35a   :  { %v1400_v56 = vpop.f32.mrf.mxu1 }
 0x35b   :  { %1512 = vst.msk [vmem:[%s2922_s9 + $0x68] sm:$0xff] %vm72_vm0, %v1406_v24  ;;  %v1401_v57 = vadd.f32 %v2751_v29, %v1400_v56 }
 0x35c   :  { %v2037_v58 = vpop.f32.mrf.mxu1 }
 0x35d   :  { %1511 = vst.msk [vmem:[%s2922_s9 + $0x60] sm:$0xff] %vm72_vm0, %v1401_v57  ;;  %v1416_v59 = vadd.f32 %v2037_v58, %v2751_v29 }
 0x35e   :  { %v1410_v61 = vpop.f32.mrf.mxu1 }
 0x35f   :  { %1514 = vst.msk [vmem:[%s2922_s9 + $0x78] sm:$0xff] %vm72_vm0, %v1416_v59  ;;  %v1411_v62 = vadd.f32 %v2751_v29, %v1410_v61 }
 0x360   :  { %v2040_v63 = vpop.f32.mrf.mxu1 }
 0x361   :  { %1513 = vst.msk [vmem:[%s2922_s9 + $0x70] sm:$0xff] %vm72_vm0, %v1411_v62  ;;  %v1426_v0 = vadd.f32 %v2040_v63, %v2751_v29 }
 0x362   :  { %v1420_v1 = vpop.f32.mrf.mxu1 }
 0x363   :  { %1516 = vst.msk [vmem:[%s2922_s9 + $0x88] sm:$0xff] %vm72_vm0, %v1426_v0  ;;  %v1421_v2 = vadd.f32 %v2751_v29, %v1420_v1 }
 0x364   :  { %v2043_v3 = vpop.f32.mrf.mxu1 }
 0x365   :  { %1515 = vst.msk [vmem:[%s2922_s9 + $0x80] sm:$0xff] %vm72_vm0, %v1421_v2  ;;  %v1436_v4 = vadd.f32 %v2043_v3, %v2751_v29 }
 0x366   :  { %v1430_v5 = vpop.f32.mrf.mxu1 }
 0x367   :  { %1518 = vst.msk [vmem:[%s2922_s9 + $0x98] sm:$0xff] %vm72_vm0, %v1436_v4  ;;  %v1431_v6 = vadd.f32 %v2751_v29, %v1430_v5 }
 0x368   :  { %v2046_v7 = vpop.f32.mrf.mxu1 }
 0x369   :  { %1517 = vst.msk [vmem:[%s2922_s9 + $0x90] sm:$0xff] %vm72_vm0, %v1431_v6  ;;  %v1446_v8 = vadd.f32 %v2046_v7, %v2751_v29 }
 0x36a   :  { %v1440_v9 = vpop.f32.mrf.mxu1 }
 0x36b   :  { %1520 = vst.msk [vmem:[%s2922_s9 + $0xa8] sm:$0xff] %vm72_vm0, %v1446_v8  ;;  %v1441_v10 = vadd.f32 %v2751_v29, %v1440_v9 }
 0x36c   :  { %v2049_v11 = vpop.f32.mrf.mxu1 }
 0x36d   :  { %1519 = vst.msk [vmem:[%s2922_s9 + $0xa0] sm:$0xff] %vm72_vm0, %v1441_v10  ;;  %v1456_v12 = vadd.f32 %v2049_v11, %v2751_v29 }
 0x36e   :  { %v1450_v13 = vpop.f32.mrf.mxu1 }
 0x36f   :  { %1522 = vst.msk [vmem:[%s2922_s9 + $0xb8] sm:$0xff] %vm72_vm0, %v1456_v12  ;;  %v1451_v47 = vadd.f32 %v2751_v29, %v1450_v13 }
 0x370   :  { %v2052_v14 = vpop.f32.mrf.mxu1 }
 0x371   :  { %1521 = vst.msk [vmem:[%s2922_s9 + $0xb0] sm:$0xff] %vm72_vm0, %v1451_v47  ;;  %v1466_v15 = vadd.f32 %v2052_v14, %v2751_v29 }
 0x372   :  { %v1460_v16 = vpop.f32.mrf.mxu1 }
 0x373   :  { %1524 = vst.msk [vmem:[%s2922_s9 + $0xc8] sm:$0xff] %vm72_vm0, %v1466_v15  ;;  %v1461_v17 = vadd.f32 %v2751_v29, %v1460_v16 }
 0x374   :  { %v2055_v18 = vpop.f32.mrf.mxu1 }
 0x375   :  { %1523 = vst.msk [vmem:[%s2922_s9 + $0xc0] sm:$0xff] %vm72_vm0, %v1461_v17  ;;  %v1476_v19 = vadd.f32 %v2055_v18, %v2751_v29 }
 0x376   :  { %v1470_v20 = vpop.f32.mrf.mxu1 }
 0x377   :  { %1526 = vst.msk [vmem:[%s2922_s9 + $0xd8] sm:$0xff] %vm72_vm0, %v1476_v19  ;;  %v1471_v21 = vadd.f32 %v2751_v29, %v1470_v20 }
 0x378   :  { %v2058_v22 = vpop.f32.mrf.mxu1 }
 0x379   :  { %1525 = vst.msk [vmem:[%s2922_s9 + $0xd0] sm:$0xff] %vm72_vm0, %v1471_v21  ;;  %v1486_v23 = vadd.f32 %v2058_v22, %v2751_v29 }
 0x37a   :  { %v1480_v25 = vpop.f32.mrf.mxu1 }
 0x37b   :  { %1528 = vst.msk [vmem:[%s2922_s9 + $0xe8] sm:$0xff] %vm72_vm0, %v1486_v23  ;;  %v1481_v26 = vadd.f32 %v2751_v29, %v1480_v25 }
 0x37c   :  { %v2061_v60 = vpop.f32.mrf.mxu1 }
 0x37d   :  { %1527 = vst.msk [vmem:[%s2922_s9 + $0xe0] sm:$0xff] %vm72_vm0, %v1481_v26  ;;  %v1496_v27 = vadd.f32 %v2061_v60, %v2751_v29 }
 0x37e   :  { %v1490_v28 = vpop.f32.mrf.mxu1 }
 0x37f   :  { %1530 = vst.msk [vmem:[%s2922_s9 + $0xf8] sm:$0xff] %vm72_vm0, %v1496_v27  ;;  %v1491_v30 = vadd.f32 %v2751_v29, %v1490_v28 }
 0x381   :  { %1529 = vst.msk [vmem:[%s2922_s9 + $0xf0] sm:$0xff] %vm72_vm0, %v1491_v30 }

</bundles_post_ra>
